<compile_context>
chip_gen: v6e
topology: v6e:2x2x1
jax: 0.10.0
libtpu: 0.0.40
codegen_flags: <defaults>
</compile_context>

<pallas_src>
import functools

import jax
import jax.numpy as jnp
from jax.experimental import pallas as pl
from jax.experimental.pallas import tpu as pltpu

BN_EPS = 1e-5


def _round_up(x, m):
    return (x + m - 1) // m * m


def _conv_stats_kernel(x_ref, w_ref, y_ref, sum_ref, sq_ref, *, H, W, Cin, Cpad):
    # x_ref:   (1, H+2, W+2, Cin)  bf16  spatially padded NHWC image
    # w_ref:   (3, 3, Cin, Cpad)   bf16  conv weights, channel-padded
    # y_ref:   (1, H*W, Cpad)      f32   conv output (pre-BN)
    # sum_ref: (1, 1, Cpad)        f32   per-channel sum over this image
    # sq_ref:  (1, 1, Cpad)        f32   per-channel sum of squares
    x = x_ref[0]          # (H+2, W+2, Cin)
    w = w_ref[...]        # (3, 3, Cin, Cpad)
    acc = jnp.zeros((H * W, Cpad), jnp.float32)
    for kh in range(3):          # 9 taps: shifted slab x weight slice matmuls
        for kw in range(3):
            slab = x[kh:kh + H, kw:kw + W, :].reshape(H * W, Cin)
            acc = acc + jnp.dot(slab, w[kh, kw],
                                preferred_element_type=jnp.float32)
    y_ref[0] = acc
    sum_ref[0] = jnp.sum(acc, axis=0, keepdims=True)
    sq_ref[0] = jnp.sum(acc * acc, axis=0, keepdims=True)


def _bn_relu_kernel(y_ref, scale_ref, shift_ref, o_ref, *, Cout):
    # y_ref:     (1, H*W, Cpad) f32   conv output
    # scale_ref: (1, Cpad)      f32   gamma * inv_std
    # shift_ref: (1, Cpad)      f32   beta - mean * gamma * inv_std
    # o_ref:     (1, Cout, H*W) f32   lane-dense output (NCHW-flattened)
    z = jnp.maximum(y_ref[0] * scale_ref[...] + shift_ref[...], 0.0)
    o_ref[0] = jnp.transpose(z)[:Cout, :]


def conv_layer_forward(x_nchw, conv_w, conv_b, bn_gamma, bn_beta):
    """x_nchw: (N, in_c, H, W); conv_w: (out_c, in_c, 3, 3); others: (out_c,)."""
    del conv_b  # cancels exactly under training-mode BatchNorm (see header)
    n, cin, h, w = x_nchw.shape
    cout = conv_w.shape[0]
    cpad = _round_up(max(cout, 1), 128)
    hw = h * w

    # NCHW -> padded NHWC bf16 (MXU operand). Spatial pad is ~1.1x the input,
    # versus the 9x blowup of a host-side im2col.
    x_nhwc = jnp.transpose(x_nchw.astype(jnp.bfloat16), (0, 2, 3, 1))
    x_pad = jnp.pad(x_nhwc, ((0, 0), (1, 1), (1, 1), (0, 0)))

    # (out_c, in_c, 3, 3) -> (3, 3, in_c, cpad), zero-padded channels, bf16.
    w_hwio = jnp.transpose(conv_w.astype(jnp.bfloat16), (2, 3, 1, 0))
    w_pad = jnp.pad(w_hwio, ((0, 0), (0, 0), (0, 0), (0, cpad - cout)))

    flops = 2 * n * hw * 9 * cin * cpad
    bytes_accessed = (x_pad.size * 2 + w_pad.size * 2
                      + n * hw * cpad * 4 + 2 * n * cpad * 4)

    # ---- Pass 1: conv (9-tap accumulated GEMM) + per-image channel stats ----
    y, csum, csq = pl.pallas_call(
        functools.partial(_conv_stats_kernel, H=h, W=w, Cin=cin, Cpad=cpad),
        out_shape=(
            jax.ShapeDtypeStruct((n, hw, cpad), jnp.float32),
            jax.ShapeDtypeStruct((n, 1, cpad), jnp.float32),
            jax.ShapeDtypeStruct((n, 1, cpad), jnp.float32),
        ),
        grid=(n,),
        in_specs=[
            pl.BlockSpec((1, h + 2, w + 2, cin), lambda b: (b, 0, 0, 0)),
            pl.BlockSpec((3, 3, cin, cpad), lambda b: (0, 0, 0, 0)),
        ],
        out_specs=(
            pl.BlockSpec((1, hw, cpad), lambda b: (b, 0, 0)),
            pl.BlockSpec((1, 1, cpad), lambda b: (b, 0, 0)),
            pl.BlockSpec((1, 1, cpad), lambda b: (b, 0, 0)),
        ),
        compiler_params=pltpu.CompilerParams(
            dimension_semantics=("parallel",)),
        cost_estimate=pl.CostEstimate(
            flops=flops, transcendentals=0, bytes_accessed=bytes_accessed),
    )(x_pad, w_pad)

    # ---- Finalize BatchNorm statistics (tiny C-length vectors, plain JAX) ----
    count = jnp.float32(n * hw)
    ch_sum = jnp.sum(csum[:, 0, :], axis=0)                   # (cpad,)
    ch_sq = jnp.sum(csq[:, 0, :], axis=0)                     # (cpad,)
    mean = ch_sum / count
    var = jnp.maximum(ch_sq / count - mean * mean, 0.0)       # biased, as PyTorch
    inv_std = jax.lax.rsqrt(var + BN_EPS)

    gamma_pad = jnp.zeros((cpad,), jnp.float32).at[:cout].set(
        bn_gamma.astype(jnp.float32))
    beta_pad = jnp.zeros((cpad,), jnp.float32).at[:cout].set(
        bn_beta.astype(jnp.float32))
    scale = (gamma_pad * inv_std).reshape(1, cpad)
    shift = (beta_pad - mean * gamma_pad * inv_std).reshape(1, cpad)

    # ---- Pass 2: fused normalize + affine + ReLU, lane-dense (C, H*W) out ----
    out_flat = pl.pallas_call(
        functools.partial(_bn_relu_kernel, Cout=cout),
        out_shape=jax.ShapeDtypeStruct((n, cout, hw), jnp.float32),
        grid=(n,),
        in_specs=[
            pl.BlockSpec((1, hw, cpad), lambda b: (b, 0, 0)),
            pl.BlockSpec((1, cpad), lambda b: (0, 0)),
            pl.BlockSpec((1, cpad), lambda b: (0, 0)),
        ],
        out_specs=pl.BlockSpec((1, cout, hw), lambda b: (b, 0, 0)),
        compiler_params=pltpu.CompilerParams(
            dimension_semantics=("parallel",)),
    )(y, scale, shift)

    # (N, out_c, H*W) -> (N, out_c, H, W): contiguous reshape, no HBM transpose.
    return out_flat.reshape(n, cout, h, w)


def _reference_forward(x_nchw, conv_w, conv_b, bn_gamma, bn_beta):
    # Pure-JAX f32 reference for correctness checking.
    y = jax.lax.conv_general_dilated(
        x_nchw.astype(jnp.float32), conv_w.astype(jnp.float32),
        window_strides=(1, 1), padding=((1, 1), (1, 1)),
        dimension_numbers=("NCHW", "OIHW", "NCHW"),
    ) + conv_b.reshape(1, -1, 1, 1)
    mean = jnp.mean(y, axis=(0, 2, 3), keepdims=True)
    var = jnp.mean((y - mean) ** 2, axis=(0, 2, 3), keepdims=True)
    y_hat = (y - mean) * jax.lax.rsqrt(var + BN_EPS)
    out = y_hat * bn_gamma.reshape(1, -1, 1, 1) + bn_beta.reshape(1, -1, 1, 1)
    return jnp.maximum(out, 0.0)


if __name__ == "__main__":
    key = jax.random.PRNGKey(0)
    k_x, k_w, k_b, k_g, k_beta = jax.random.split(key, 5)

    N, IN_C, OUT_C, H, W = 2, 4, 8, 16, 16

    x = jax.random.normal(k_x, (N, IN_C, H, W), dtype=jnp.float32)
    # Deterministic synthetic parameters (not a checkpoint load).
    fan_in = IN_C * 3 * 3
    bound = 1.0 / (fan_in ** 0.5)
    conv_w = jax.random.uniform(k_w, (OUT_C, IN_C, 3, 3), jnp.float32, -bound, bound)
    conv_b = jax.random.uniform(k_b, (OUT_C,), jnp.float32, -bound, bound)
    bn_gamma = 1.0 + 0.1 * jax.random.normal(k_g, (OUT_C,), jnp.float32)
    bn_beta = 0.1 * jax.random.normal(k_beta, (OUT_C,), jnp.float32)

    out = conv_layer_forward(x, conv_w, conv_b, bn_gamma, bn_beta)
    out = jax.block_until_ready(out)

    ref = _reference_forward(x, conv_w, conv_b, bn_gamma, bn_beta)
    assert out.shape == (N, OUT_C, H, W)
    # bf16 GEMM operands vs f32 reference -> relaxed tolerance.
    assert jnp.max(jnp.abs(out - ref)) < 5e-2, "mismatch vs. JAX reference"

    print("KERNEL_OK")
</pallas_src>

<mosaic_0001>
module attributes {stable_mosaic.version = 11 : i64} {
  func.func @_conv_stats_kernel(%arg0: i32, %arg1: memref<1x18x18x4xbf16, #tpu.memory_space<vmem>>, %arg2: memref<3x3x4x128xbf16, #tpu.memory_space<vmem>>, %arg3: memref<1x256x128xf32, #tpu.memory_space<vmem>>, %arg4: memref<1x1x128xf32, #tpu.memory_space<vmem>>, %arg5: memref<1x1x128xf32, #tpu.memory_space<vmem>>) attributes {dimension_semantics = [#tpu.dimension_semantics<parallel>], iteration_bounds = array<i64: 2>, scalar_prefetch = 0 : i64, scratch_operands = 0 : i64, tpu.core_type = #tpu.core_type<tc>, window_params = [{transform_indices = @transform_0, window_bounds = array<i64: 1, 18, 18, 4>}, {pipeline_mode = #tpu.pipeline_mode<synchronous>, transform_indices = @transform_1, window_bounds = array<i64: 3, 3, 4, 128>}, {transform_indices = @transform_2, window_bounds = array<i64: 1, 256, 128>}, {transform_indices = @transform_3, window_bounds = array<i64: 1, 1, 128>}, {transform_indices = @transform_4, window_bounds = array<i64: 1, 1, 128>}]} {
    %c0 = arith.constant 0 : index
    %c0_0 = arith.constant 0 : index
    %c0_1 = arith.constant 0 : index
    %c0_2 = arith.constant 0 : index
    %0 = vector.load %arg1[%c0, %c0_0, %c0_1, %c0_2] : memref<1x18x18x4xbf16, #tpu.memory_space<vmem>>, vector<1x18x18x4xbf16>
    %1 = vector.shape_cast %0 : vector<1x18x18x4xbf16> to vector<18x18x4xbf16>
    %c0_3 = arith.constant 0 : index
    %c0_4 = arith.constant 0 : index
    %c0_5 = arith.constant 0 : index
    %c0_6 = arith.constant 0 : index
    %2 = vector.load %arg2[%c0_3, %c0_4, %c0_5, %c0_6] : memref<3x3x4x128xbf16, #tpu.memory_space<vmem>>, vector<3x3x4x128xbf16>
    %cst = arith.constant 0.000000e+00 : f32
    %3 = vector.broadcast %cst : f32 to vector<256x128xf32>
    %4 = vector.extract_strided_slice %1 {offsets = [0, 0, 0], sizes = [16, 16, 4], strides = [1, 1, 1]} : vector<18x18x4xbf16> to vector<16x16x4xbf16>
    %5 = vector.shape_cast %4 : vector<16x16x4xbf16> to vector<256x4xbf16>
    %6 = vector.extract_strided_slice %2 {offsets = [0, 0, 0, 0], sizes = [1, 1, 4, 128], strides = [1, 1, 1, 1]} : vector<3x3x4x128xbf16> to vector<1x1x4x128xbf16>
    %7 = vector.shape_cast %6 : vector<1x1x4x128xbf16> to vector<4x128xbf16>
    %cst_7 = arith.constant dense<0.000000e+00> : vector<256x128xf32>
    %8 = tpu.matmul %5, %7, %cst_7 {dimension_numbers = #tpu.dot_dimension_numbers<[1], [0], [0], [1], [0, 0, 1, 1], [], []>} : vector<256x4xbf16>, vector<4x128xbf16>, vector<256x128xf32> -> vector<256x128xf32>
    %9 = arith.addf %3, %8 : vector<256x128xf32>
    %10 = vector.extract_strided_slice %1 {offsets = [0, 1, 0], sizes = [16, 16, 4], strides = [1, 1, 1]} : vector<18x18x4xbf16> to vector<16x16x4xbf16>
    %11 = vector.shape_cast %10 : vector<16x16x4xbf16> to vector<256x4xbf16>
    %12 = vector.extract_strided_slice %2 {offsets = [0, 1, 0, 0], sizes = [1, 1, 4, 128], strides = [1, 1, 1, 1]} : vector<3x3x4x128xbf16> to vector<1x1x4x128xbf16>
    %13 = vector.shape_cast %12 : vector<1x1x4x128xbf16> to vector<4x128xbf16>
    %cst_8 = arith.constant dense<0.000000e+00> : vector<256x128xf32>
    %14 = tpu.matmul %11, %13, %cst_8 {dimension_numbers = #tpu.dot_dimension_numbers<[1], [0], [0], [1], [0, 0, 1, 1], [], []>} : vector<256x4xbf16>, vector<4x128xbf16>, vector<256x128xf32> -> vector<256x128xf32>
    %15 = arith.addf %9, %14 : vector<256x128xf32>
    %16 = vector.extract_strided_slice %1 {offsets = [0, 2, 0], sizes = [16, 16, 4], strides = [1, 1, 1]} : vector<18x18x4xbf16> to vector<16x16x4xbf16>
    %17 = vector.shape_cast %16 : vector<16x16x4xbf16> to vector<256x4xbf16>
    %18 = vector.extract_strided_slice %2 {offsets = [0, 2, 0, 0], sizes = [1, 1, 4, 128], strides = [1, 1, 1, 1]} : vector<3x3x4x128xbf16> to vector<1x1x4x128xbf16>
    %19 = vector.shape_cast %18 : vector<1x1x4x128xbf16> to vector<4x128xbf16>
    %cst_9 = arith.constant dense<0.000000e+00> : vector<256x128xf32>
    %20 = tpu.matmul %17, %19, %cst_9 {dimension_numbers = #tpu.dot_dimension_numbers<[1], [0], [0], [1], [0, 0, 1, 1], [], []>} : vector<256x4xbf16>, vector<4x128xbf16>, vector<256x128xf32> -> vector<256x128xf32>
    %21 = arith.addf %15, %20 : vector<256x128xf32>
    %22 = vector.extract_strided_slice %1 {offsets = [1, 0, 0], sizes = [16, 16, 4], strides = [1, 1, 1]} : vector<18x18x4xbf16> to vector<16x16x4xbf16>
    %23 = vector.shape_cast %22 : vector<16x16x4xbf16> to vector<256x4xbf16>
    %24 = vector.extract_strided_slice %2 {offsets = [1, 0, 0, 0], sizes = [1, 1, 4, 128], strides = [1, 1, 1, 1]} : vector<3x3x4x128xbf16> to vector<1x1x4x128xbf16>
    %25 = vector.shape_cast %24 : vector<1x1x4x128xbf16> to vector<4x128xbf16>
    %cst_10 = arith.constant dense<0.000000e+00> : vector<256x128xf32>
    %26 = tpu.matmul %23, %25, %cst_10 {dimension_numbers = #tpu.dot_dimension_numbers<[1], [0], [0], [1], [0, 0, 1, 1], [], []>} : vector<256x4xbf16>, vector<4x128xbf16>, vector<256x128xf32> -> vector<256x128xf32>
    %27 = arith.addf %21, %26 : vector<256x128xf32>
    %28 = vector.extract_strided_slice %1 {offsets = [1, 1, 0], sizes = [16, 16, 4], strides = [1, 1, 1]} : vector<18x18x4xbf16> to vector<16x16x4xbf16>
    %29 = vector.shape_cast %28 : vector<16x16x4xbf16> to vector<256x4xbf16>
    %30 = vector.extract_strided_slice %2 {offsets = [1, 1, 0, 0], sizes = [1, 1, 4, 128], strides = [1, 1, 1, 1]} : vector<3x3x4x128xbf16> to vector<1x1x4x128xbf16>
    %31 = vector.shape_cast %30 : vector<1x1x4x128xbf16> to vector<4x128xbf16>
    %cst_11 = arith.constant dense<0.000000e+00> : vector<256x128xf32>
    %32 = tpu.matmul %29, %31, %cst_11 {dimension_numbers = #tpu.dot_dimension_numbers<[1], [0], [0], [1], [0, 0, 1, 1], [], []>} : vector<256x4xbf16>, vector<4x128xbf16>, vector<256x128xf32> -> vector<256x128xf32>
    %33 = arith.addf %27, %32 : vector<256x128xf32>
    %34 = vector.extract_strided_slice %1 {offsets = [1, 2, 0], sizes = [16, 16, 4], strides = [1, 1, 1]} : vector<18x18x4xbf16> to vector<16x16x4xbf16>
    %35 = vector.shape_cast %34 : vector<16x16x4xbf16> to vector<256x4xbf16>
    %36 = vector.extract_strided_slice %2 {offsets = [1, 2, 0, 0], sizes = [1, 1, 4, 128], strides = [1, 1, 1, 1]} : vector<3x3x4x128xbf16> to vector<1x1x4x128xbf16>
    %37 = vector.shape_cast %36 : vector<1x1x4x128xbf16> to vector<4x128xbf16>
    %cst_12 = arith.constant dense<0.000000e+00> : vector<256x128xf32>
    %38 = tpu.matmul %35, %37, %cst_12 {dimension_numbers = #tpu.dot_dimension_numbers<[1], [0], [0], [1], [0, 0, 1, 1], [], []>} : vector<256x4xbf16>, vector<4x128xbf16>, vector<256x128xf32> -> vector<256x128xf32>
    %39 = arith.addf %33, %38 : vector<256x128xf32>
    %40 = vector.extract_strided_slice %1 {offsets = [2, 0, 0], sizes = [16, 16, 4], strides = [1, 1, 1]} : vector<18x18x4xbf16> to vector<16x16x4xbf16>
    %41 = vector.shape_cast %40 : vector<16x16x4xbf16> to vector<256x4xbf16>
    %42 = vector.extract_strided_slice %2 {offsets = [2, 0, 0, 0], sizes = [1, 1, 4, 128], strides = [1, 1, 1, 1]} : vector<3x3x4x128xbf16> to vector<1x1x4x128xbf16>
    %43 = vector.shape_cast %42 : vector<1x1x4x128xbf16> to vector<4x128xbf16>
    %cst_13 = arith.constant dense<0.000000e+00> : vector<256x128xf32>
    %44 = tpu.matmul %41, %43, %cst_13 {dimension_numbers = #tpu.dot_dimension_numbers<[1], [0], [0], [1], [0, 0, 1, 1], [], []>} : vector<256x4xbf16>, vector<4x128xbf16>, vector<256x128xf32> -> vector<256x128xf32>
    %45 = arith.addf %39, %44 : vector<256x128xf32>
    %46 = vector.extract_strided_slice %1 {offsets = [2, 1, 0], sizes = [16, 16, 4], strides = [1, 1, 1]} : vector<18x18x4xbf16> to vector<16x16x4xbf16>
    %47 = vector.shape_cast %46 : vector<16x16x4xbf16> to vector<256x4xbf16>
    %48 = vector.extract_strided_slice %2 {offsets = [2, 1, 0, 0], sizes = [1, 1, 4, 128], strides = [1, 1, 1, 1]} : vector<3x3x4x128xbf16> to vector<1x1x4x128xbf16>
    %49 = vector.shape_cast %48 : vector<1x1x4x128xbf16> to vector<4x128xbf16>
    %cst_14 = arith.constant dense<0.000000e+00> : vector<256x128xf32>
    %50 = tpu.matmul %47, %49, %cst_14 {dimension_numbers = #tpu.dot_dimension_numbers<[1], [0], [0], [1], [0, 0, 1, 1], [], []>} : vector<256x4xbf16>, vector<4x128xbf16>, vector<256x128xf32> -> vector<256x128xf32>
    %51 = arith.addf %45, %50 : vector<256x128xf32>
    %52 = vector.extract_strided_slice %1 {offsets = [2, 2, 0], sizes = [16, 16, 4], strides = [1, 1, 1]} : vector<18x18x4xbf16> to vector<16x16x4xbf16>
    %53 = vector.shape_cast %52 : vector<16x16x4xbf16> to vector<256x4xbf16>
    %54 = vector.extract_strided_slice %2 {offsets = [2, 2, 0, 0], sizes = [1, 1, 4, 128], strides = [1, 1, 1, 1]} : vector<3x3x4x128xbf16> to vector<1x1x4x128xbf16>
    %55 = vector.shape_cast %54 : vector<1x1x4x128xbf16> to vector<4x128xbf16>
    %cst_15 = arith.constant dense<0.000000e+00> : vector<256x128xf32>
    %56 = tpu.matmul %53, %55, %cst_15 {dimension_numbers = #tpu.dot_dimension_numbers<[1], [0], [0], [1], [0, 0, 1, 1], [], []>} : vector<256x4xbf16>, vector<4x128xbf16>, vector<256x128xf32> -> vector<256x128xf32>
    %57 = arith.addf %51, %56 : vector<256x128xf32>
    %c0_16 = arith.constant 0 : index
    %c0_17 = arith.constant 0 : index
    %c0_18 = arith.constant 0 : index
    %58 = vector.load %arg3[%c0_16, %c0_17, %c0_18] : memref<1x256x128xf32, #tpu.memory_space<vmem>>, vector<1x256x128xf32>
    %59 = vector.shape_cast %58 : vector<1x256x128xf32> to vector<256x128xf32>
    %60 = vector.shape_cast %57 : vector<256x128xf32> to vector<1x256x128xf32>
    tpu.vector_store %arg3[%c0_16, %c0_17, %c0_18], %60 {strides = array<i32>} : memref<1x256x128xf32, #tpu.memory_space<vmem>>, vector<1x256x128xf32>,
    %cst_19 = arith.constant dense<0.000000e+00> : vector<128xf32>
    %61 = vector.multi_reduction <add>, %57, %cst_19 [0] : vector<256x128xf32> to vector<128xf32>
    %62 = vector.shape_cast %61 : vector<128xf32> to vector<1x128xf32>
    %c0_20 = arith.constant 0 : index
    %c0_21 = arith.constant 0 : index
    %c0_22 = arith.constant 0 : index
    %63 = vector.load %arg4[%c0_20, %c0_21, %c0_22] : memref<1x1x128xf32, #tpu.memory_space<vmem>>, vector<1x1x128xf32>
    %64 = vector.shape_cast %63 : vector<1x1x128xf32> to vector<1x128xf32>
    %65 = vector.shape_cast %62 : vector<1x128xf32> to vector<1x1x128xf32>
    tpu.vector_store %arg4[%c0_20, %c0_21, %c0_22], %65 {strides = array<i32>} : memref<1x1x128xf32, #tpu.memory_space<vmem>>, vector<1x1x128xf32>,
    %66 = arith.mulf %57, %57 : vector<256x128xf32>
    %cst_23 = arith.constant dense<0.000000e+00> : vector<128xf32>
    %67 = vector.multi_reduction <add>, %66, %cst_23 [0] : vector<256x128xf32> to vector<128xf32>
    %68 = vector.shape_cast %67 : vector<128xf32> to vector<1x128xf32>
    %c0_24 = arith.constant 0 : index
    %c0_25 = arith.constant 0 : index
    %c0_26 = arith.constant 0 : index
    %69 = vector.load %arg5[%c0_24, %c0_25, %c0_26] : memref<1x1x128xf32, #tpu.memory_space<vmem>>, vector<1x1x128xf32>
    %70 = vector.shape_cast %69 : vector<1x1x128xf32> to vector<1x128xf32>
    %71 = vector.shape_cast %68 : vector<1x128xf32> to vector<1x1x128xf32>
    tpu.vector_store %arg5[%c0_24, %c0_25, %c0_26], %71 {strides = array<i32>} : memref<1x1x128xf32, #tpu.memory_space<vmem>>, vector<1x1x128xf32>,
    return
  }
  func.func @transform_0(%arg0: i32) -> (i32, i32, i32, i32) {
    %c0_i32 = arith.constant 0 : i32
    %c0_i32_0 = arith.constant 0 : i32
    %c0_i32_1 = arith.constant 0 : i32
    %c0_i32_2 = arith.constant 0 : i32
    return %arg0, %c0_i32, %c0_i32_0, %c0_i32_1 : i32, i32, i32, i32
  }
  func.func @transform_1(%arg0: i32) -> (i32, i32, i32, i32) {
    %c0_i32 = arith.constant 0 : i32
    %c0_i32_0 = arith.constant 0 : i32
    %c0_i32_1 = arith.constant 0 : i32
    %c0_i32_2 = arith.constant 0 : i32
    %c0_i32_3 = arith.constant 0 : i32
    return %c0_i32, %c0_i32_0, %c0_i32_1, %c0_i32_2 : i32, i32, i32, i32
  }
  func.func @transform_2(%arg0: i32) -> (i32, i32, i32) {
    %c0_i32 = arith.constant 0 : i32
    %c0_i32_0 = arith.constant 0 : i32
    %c0_i32_1 = arith.constant 0 : i32
    return %arg0, %c0_i32, %c0_i32_0 : i32, i32, i32
  }
  func.func @transform_3(%arg0: i32) -> (i32, i32, i32) {
    %c0_i32 = arith.constant 0 : i32
    %c0_i32_0 = arith.constant 0 : i32
    %c0_i32_1 = arith.constant 0 : i32
    return %arg0, %c0_i32, %c0_i32_0 : i32, i32, i32
  }
  func.func @transform_4(%arg0: i32) -> (i32, i32, i32) {
    %c0_i32 = arith.constant 0 : i32
    %c0_i32_0 = arith.constant 0 : i32
    %c0_i32_1 = arith.constant 0 : i32
    return %arg0, %c0_i32, %c0_i32_0 : i32, i32, i32
  }
}

</mosaic_0001>

<bundles_post_ra>
// kernel: tpu_custom_call.1
= control target key start
LH: loop header
LB: loop body
LE: loop exit
PB: predicated region body
PF: predicated region fallthrough
CT: control target
= control target key end

     0   :  { %10 = vsyncpa [#allocation3], 0  ;;  %s5771_s0 = inlined_call_operand.vmem [shape: bf16[2,18,18,4], index: 0, kind: input, shape index: {}]   ;;  %s5772_s1 = inlined_call_operand.vmem [shape: bf16[3,3,4,128], index: 1, kind: input, shape index: {}]   ;;  %s5773_s2 = inlined_call_operand.hbm [shape: f32[2,256,128], index: 2, kind: output, shape index: {0}]   ;;  %s5774_s3 = inlined_call_operand.hbm [shape: f32[2,1,128], index: 3, kind: output, shape index: {1}]   ;;  %s5775_s4 = inlined_call_operand.hbm [shape: f32[2,1,128], index: 4, kind: output, shape index: {2}]  }
   0x1   :  { %12 = vsyncpa [#allocation3 + $0x1], 0 }
   0x2   :  { %13 = vsyncpa [#allocation5], 0 }
   0x3   :  { %15 = vsyncpa [#allocation5 + $0x1], 0  ;;  %s4142_s15 = smov 0   ;;  %s4144_s16 = smov 0  }
   0x4   :  { %s4146_s17 = smov 0   ;;  %s4148_s18 = smov 0  }
   0x5 LB: > { %s4163_s19 = sadd.s32 4294967295, %s4110_s18   ;;  %s3223_s20 = sadd.s32 4294967294, %s4110_s18   ;;  %s4110_s18 = sphi %s4148_s18, %s5985_s18   ;;  %s4106_s17 = sphi %s4146_s17, %s5984_s17   ;;  %s4102_s16 = sphi %s4144_s16, %s5983_s16   ;;  %s4098_s15 = sphi %s4142_s15, %s5982_s15  }
   0x6   : > { %s4167_s21 = sadd.s32 1, %s4110_s18   ;;  %s75_s22 = sadd.s32 1, %s4106_s17 }
   0x7   : > { %s72_s23 = ssub.s32 %s4110_s18, %s4167_s21  ;;  %p85_p0 = scmp.ne.s32.totalorder %s4106_s17, %s4102_s16 }
   0x8   : > { %p73_p1 = scmp.eq.s32.totalorder %s72_s23, 0  ;;  %p86_p2 = scmp.eq.s32.totalorder %s4163_s19, 1 }
   0x9   : > { %p91_p3 = scmp.ne.s32.totalorder %s4102_s16, %s4098_s15  ;;  %p92_p4 = scmp.eq.s32.totalorder %s3223_s20, 1 }
   0xa   : > { %s4180_s24 = scalar_select %p73_p1, %s4106_s17, %s75_s22  }
   0xb   : > { %p4182_p5 = por %p86_p2, %p85_p0  ;;  %p4186_p6 = por %p92_p4, %p91_p3 }
   0xc   : > { %p3226_p7 = scmp.ge.s32.totalorder %s4110_s18, 1  ;;  %p173_p8 = scmp.lt.s32.totalorder %s4110_s18, 3 }
   0xe   : > { %p174_p9 = pnand %p3226_p7, %p173_p8 }
  0x10   : > { %177 = sbr.rel (%p174_p9) target bundleno = 625 (0x271), region = 28 }
  0x15   : > { %v268_v0 = vld [vmem:[%s5772_s1 + $0x2] sm:$0x3]  ;;  %vm760_vm0 = vcmask 1041408   ;;  %p207_p10 = scmp.lt.s32.totalorder %s4163_s19, 1  ;;  %v267_v2 = vld [vmem:[%s5772_s1] sm:$0x3] }
  0x16   : > { %3915 = vmatprep.subr.msk.bf16.mxu1 %vm760_vm0, %v268_v0  ;;  %3914 = vmatprep.subr.msk.bf16.mxu0 %vm760_vm0, %v268_v0  ;;  %v762_v1 = vsel %vm760_vm0, %v268_v0, 0  ;;  %v269_v3 = vld [vmem:[%s5772_s1 + $0x4] sm:$0x3]  ;;  %vm276_vm1 = vsmask.f32 3328  ;;  %v4214_v4 = vsel %vm760_vm0, %v267_v2, 0 }
  0x17   : > { %3913 = vmatpush3.bf16.msra.mxu1 %v762_v1  ;;  %3607 = vmatpush3.bf16.msra.mxu0 %v762_v1  ;;  %s208_s5 = scalar_select %p207_p10, %s4163_s19, 1  ;;  %vm277_vm2 = vsmask.f32 7440  ;;  %v4217_v5 = vsel %vm760_vm0, %v269_v3, 0  ;;  %vm711_vm3 = vcmask 31744   ;;  %v5821_v32 = vmov 0 }
  0x18   : > { %3916 = vmatprep.subr.msk.bf16.mxu1 %vm760_vm0, %v267_v2  ;;  %3917 = vmatprep.subr.msk.bf16.mxu0 %vm760_vm0, %v269_v3  ;;  %vm4256_vm4 = vmor %vm276_vm1, %vm277_vm2  ;;  %vm1233_vm5 = vcmask 1042432   ;;  %vm1234_vm6 = vcmask 1046532   ;;  %s4112_s28 = smov [#allocation2]  }
  0x19   : > { %s3924_s8 = smul.u32 216, %s208_s5  ;;  %v5822_v32 = vsel %vm4256_vm4, 4294967295, %v5821_v32  ;;  %vm4579_vm7 = vmor %vm1233_vm5, %vm1234_vm6  ;;  %s3998_s29 = sshll.u32 %s4112_s28, 4  ;;  %s3999_s29 = int_to_ptr.vmem [resolvable:$false] %s3998_s29 }
  0x1a   : > { %5823 = vst [vmem:[#allocation9_spill] sm:$0xff] %v5822_v32  ;;  %s4000_s30 = scalar_lea.vmem %s3999_s29, 8192 }
  0x1b   : > { %s4211_s11 = scalar_lea.vmem %s5771_s0, %s3924_s8  ;;  %s5522_s8 = sand.u32 1, %s4102_s16  }
  0x1c   : > { %v4220_v6 = vld [vmem:[%s4211_s11] sm:$0xf]  ;;  %v4223_v7 = vld [vmem:[%s4211_s11 + $0x4] sm:$0xf]  ;;  %v4226_v8 = vld [vmem:[%s4211_s11 + $0x8] sm:$0x1] }
  0x1d   : > { %v280_v9 = vshrl.u32 %v4220_v6, 16  ;;  %v283_v10 = vshll.u32 %v4220_v6, 16  ;;  %v289_v11 = vshll.u32 %v4223_v7, 16  ;;  %v293_v12 = vshrl.u32 %v4223_v7, 16  ;;  %v4233_v13 = vld [vmem:[%s4211_s11 + $0x60] sm:$0xf] }
  0x1e   : > { %v299_v14 = vshll.u32 %v4226_v8, 16  ;;  %v4238_v16 = vld [vmem:[%s4211_s11 + $0x64] sm:$0xf]  ;;  %v4241_v17 = vld [vmem:[%s4211_s11 + $0x68] sm:$0x1]  ;;  %v472_v23 = vshrl.u32 %v4233_v13, 16 }
  0x1f   : > { %v282_v18 = vrot.slane %v280_v9, 4  ;;  %v285_v19 = vrot.slane %v283_v10, 5  ;;  %v291_v20 = vrot.slane %v289_v11, 5  ;;  %v295_v21 = vrot.slane %v293_v12, 4  ;;  %v4249_v30 = vld [vmem:[%s4211_s11 + $0xc] sm:$0xf] }
  0x20   : > { %v301_v22 = vrot.slane %v299_v14, 5  ;;  %v475_v24 = vshll.u32 %v4233_v13, 16  ;;  %v481_v25 = vshll.u32 %v4238_v16, 16  ;;  %v485_v28 = vshrl.u32 %v4238_v16, 16  ;;  %v4252_v31 = vld [vmem:[%s4211_s11 + $0x10] sm:$0xf] }
  0x21   : > { %v286_v26 = vor.u32 %v285_v19, %v282_v18  ;;  %v296_v27 = vor.u32 %v295_v21, %v291_v20  ;;  %v491_v29 = vshll.u32 %v4241_v17, 16  ;;  %v474_v33 = vrot.slane %v472_v23, 4  ;;  %v4263_v42 = vld [vmem:[%s4211_s11 + $0x14] sm:$0x1]  ;;  %v4274_v54 = vld [vmem:[%s4211_s11 + $0x6c] sm:$0xf] }
  0x22   : > { %v477_v34 = vrot.slane %v475_v24, 5  ;;  %v483_v35 = vrot.slane %v481_v25, 5  ;;  %v487_v39 = vrot.slane %v485_v28, 4  ;;  %v304_v43 = vshrl.u32 %v4249_v30, 16  ;;  %5824 = vst [vmem:[#allocation10_spill] sm:$0xff] %v4274_v54  ;;  %s3227_s9 = sshll.u32 %s5522_s8, 8 }
  0x23   : > { %v287_v37 = vrot.slane %v286_v26, 4  ;;  %v297_v38 = vrot.slane %v296_v27, 4  ;;  %v493_v40 = vrot.slane %v491_v29, 5  ;;  %v307_v44 = vshll.u32 %v4249_v30, 16  ;;  %v4278_v59 = vld [vmem:[%s4211_s11 + $0x70] sm:$0xf] }
  0x24   : > { %v478_v41 = vor.u32 %v477_v34, %v474_v33  ;;  %v313_v45 = vshll.u32 %v4252_v31, 16  ;;  %v488_v48 = vor.u32 %v487_v39, %v483_v35  ;;  %v317_v49 = vshrl.u32 %v4252_v31, 16  ;;  %v4286_v0 = vld [vmem:[%s4211_s11 + $0x74] sm:$0x1]  ;;  %v4292_v10 = vld [vmem:[%s4211_s11 + $0x18] sm:$0xf] }
  0x25   : > { %v292_v46 = vsel %vm4256_vm4, %v287_v37, %v291_v20  ;;  %v302_v47 = vsel %vm4256_vm4, %v297_v38, %v301_v22  ;;  %v306_v52 = vrot.slane %v304_v43, 4  ;;  %v309_v53 = vrot.slane %v307_v44, 5  ;;  %5825 = vst [vmem:[#allocation11_spill] sm:$0xff] %v4286_v0  ;;  %v4301_v23 = vld [vmem:[%s4211_s11 + $0x1c] sm:$0xf]  ;;  %s5540_s10 = scalar_lea.vmem [#allocation2], %s3227_s9 }
  0x26   : > { %v3229_v50 = vcombine.low %v292_v46, %v302_v47  ;;  %v479_v51 = vrot.slane %v478_v41, 4  ;;  %v489_v55 = vrot.slane %v488_v48, 4  ;;  %v315_v56 = vrot.slane %v313_v45, 5  ;;  %v4308_v27 = vld [vmem:[%s4211_s11 + $0x20] sm:$0x1]  ;;  %s3082_s12 = sshll.u32 %s5540_s10, 4  ;;  %s5659_s12 = int_to_ptr.vmem [resolvable:$true] %s3082_s12 }
  0x27   : > { %v319_v57 = vrot.slane %v317_v49, 4  ;;  %v323_v58 = vshll.u32 %v4263_v42, 16  ;;  %v310_v61 = vor.u32 %v309_v53, %v306_v52  ;;  %v496_v9 = vshrl.u32 %v4274_v54, 16  ;;  %v4315_v37 = vld [vmem:[%s4211_s11 + $0x78] sm:$0xf]  ;;  %s3061_s23 = scalar_lea.sflag [#allocation3], %s5522_s8  ;;  %p4001_p0 = scmp.lt.s32.totalorder %s5659_s12, %s3999_s29 }
  0x28   : > { %3608 = vmatprep.mubr.msk.bf16.mxu0 %vm711_vm3, %v3229_v50  ;;  %v484_v60 = vsel %vm4256_vm4, %v479_v51, %v483_v35  ;;  %v494_v1 = vsel %vm4256_vm4, %v489_v55, %v493_v40  ;;  %v499_v14 = vshll.u32 %v4274_v54, 16  ;;  %v505_v18 = vshll.u32 %v4278_v59, 16  ;;  %5827 = vst [vmem:[#allocation13_spill] sm:$0xff] %v4315_v37  ;;  %v4323_v43 = vld [vmem:[%s5772_s1 + $0x8] sm:$0x3]  ;;  %s3994_s27 = scalar_lea.vmem %s5659_s12, 4096 }
  0x29   : > { %v320_v2 = vor.u32 %v319_v57, %v315_v56  ;;  %v325_v3 = vrot.slane %v323_v58, 5  ;;  %v4294_v11 = vcombine.low %v484_v60, %v494_v1  ;;  %v311_v12 = vrot.slane %v310_v61, 4  ;;  %v4328_v48 = vld [vmem:[%s4211_s11 + $0x7c] sm:$0xf]  ;;  %v4336_v58 = vld [vmem:[%s4211_s11 + $0x80] sm:$0x1]  ;;  %p3995_p11 = scmp.ne.s32.totalorder %s5659_s12, %s3994_s27  ;;  %p4002_p1 = scmp.lt.s32.totalorder %s4000_s30, %s3994_s27 }
  0x2a   : > { %v498_v20 = vrot.slane %v496_v9, 4  ;;  %v509_v21 = vshrl.u32 %v4278_v59, 16  ;;  %v515_v22 = vshll.u32 %v4286_v0, 16  ;;  %v501_v25 = vrot.slane %v499_v14, 5  ;;  %5829 = vst [vmem:[#allocation15_spill] sm:$0xff] %v4328_v48  ;;  %5830 = vst [vmem:[#allocation16_spill] sm:$0xff] %v4336_v58 }
  0x2b   : > { %5826 = vst [vmem:[#allocation12_spill] sm:$0xff] %v4294_v11  ;;  %v321_v19 = vrot.slane %v320_v2, 4  ;;  %3624 = vmatprep.mubr.msk.bf16.mxu1 %vm711_vm3, %v4294_v11  ;;  %v316_v24 = vsel %vm4256_vm4, %v311_v12, %v315_v56  ;;  %v507_v26 = vrot.slane %v505_v18, 5  ;;  %v328_v28 = vshrl.u32 %v4292_v10, 16  ;;  %v4350_v18 = vld [vmem:[%s4211_s11 + $0x28] sm:$0xf]  ;;  %p3996_p12 = pnand %p3995_p11, %p4182_p5  ;;  %p4003_p2 = por %p4002_p1, %p4001_p0 }
  0x2c   : > { %v511_v33 = vrot.slane %v509_v21, 4  ;;  %v517_v34 = vrot.slane %v515_v22, 5  ;;  %v331_v35 = vshll.u32 %v4292_v10, 16  ;;  %v502_v39 = vor.u32 %v501_v25, %v498_v20 }
  0x2d   : > { %v326_v29 = vsel %vm4256_vm4, %v321_v19, %v325_v3  ;;  %v330_v40 = vrot.slane %v328_v28, 4  ;;  %v337_v41 = vshll.u32 %v4301_v23, 16  ;;  %v341_v46 = vshrl.u32 %v4301_v23, 16  ;;  %v4342_v3 = vld [vmem:[%s4211_s11 + $0x24] sm:$0xf]  ;;  %p3997_p13 = pneg %p3996_p12 }
  0x2e   : > { %v4317_v38 = vcombine.low %v316_v24, %v326_v29  ;;  %v512_v44 = vor.u32 %v511_v33, %v507_v26  ;;  %v333_v45 = vrot.slane %v331_v35, 5  ;;  %v347_v47 = vshll.u32 %v4308_v27, 16  ;;  %v4358_v24 = vld [vmem:[%s5772_s1 + $0x6] sm:$0x3]  ;;  %v4363_v29 = vld [vmem:[%s4211_s11 + $0x2c] sm:$0x1] }
  0x2f   : > { %v503_v49 = vrot.slane %v502_v39, 4  ;;  %v339_v50 = vrot.slane %v337_v41, 5  ;;  %v520_v51 = vshrl.u32 %v4315_v37, 16  ;;  %v523_v52 = vshll.u32 %v4315_v37, 16  ;;  %v4371_v41 = vld [vmem:[%s4211_s11 + $0x84] sm:$0xf]  ;;  %p4004_p3 = pnand %p4003_p2, %p3997_p13 }
  0x30   : > { %5828 = vst [vmem:[#allocation14_spill] sm:$0xff] %v4317_v38  ;;  %3609 = vmatmul.mubr.msk.bf16.vlgmr.msra.gmra.mxu0 %vm711_vm3, %v4317_v38  ;;  %v513_v53 = vrot.slane %v512_v44, 4  ;;  %v334_v55 = vor.u32 %v333_v45, %v330_v40  ;;  %v343_v56 = vrot.slane %v341_v46, 4  ;;  %v349_v57 = vrot.slane %v347_v47, 5  ;;  %v4518_v38 = vld [vmem:[%s4211_s11 + $0xb0] sm:$0x1] }
  0x31   : > { %3675 = vmatpush3.bf16.msra.mxu0 %v4217_v5  ;;  %v508_v60 = vsel %vm4256_vm4, %v503_v49, %v507_v26  ;;  %v522_v61 = vrot.slane %v520_v51, 4  ;;  %v525_v1 = vrot.slane %v523_v52, 5  ;;  %v529_v2 = vshll.u32 %v4328_v48, 16  ;;  %v4378_v49 = vld [vmem:[%s4211_s11 + $0x88] sm:$0xf]  ;;  %5842 = vst [vmem:[#allocation28_spill] sm:$0xff] %v4518_v38 }
  0x32   : > { %3919 = vmatprep.subr.msk.bf16.mxu0 %vm760_vm0, %v4323_v43  ;;  %v518_v5 = vsel %vm4256_vm4, %v513_v53, %v517_v34  ;;  %v335_v9 = vrot.slane %v334_v55, 4  ;;  %v344_v12 = vor.u32 %v343_v56, %v339_v50  ;;  %v533_v14 = vshrl.u32 %v4328_v48, 16  ;;  %v4540_v48 = vld [vmem:[%s4211_s11 + $0x5c] sm:$0x1] }
  0x33   : > { %v4352_v19 = vcombine.low %v508_v60, %v518_v5  ;;  %v526_v20 = vor.u32 %v525_v1, %v522_v61  ;;  %v531_v21 = vrot.slane %v529_v2, 5  ;;  %v539_v22 = vshll.u32 %v4336_v58, 16 }
  0x34   : > { %v340_v25 = vsel %vm4256_vm4, %v335_v9, %v339_v50  ;;  %v345_v26 = vrot.slane %v344_v12, 4  ;;  %v535_v28 = vrot.slane %v533_v14, 4  ;;  %v352_v33 = vshrl.u32 %v4342_v3, 16  ;;  %v4397_v9 = vld [vmem:[%s4211_s11 + $0x30] sm:$0xf] }
  0x35   : > { %5831 = vst [vmem:[#allocation17_spill] sm:$0xff] %v4352_v19  ;;  %3625 = vmatmul.mubr.msk.bf16.vlgmr.msra.gmra.mxu1 %vm711_vm3, %v4352_v19  ;;  %v527_v34 = vrot.slane %v526_v20, 4  ;;  %v541_v35 = vrot.slane %v539_v22, 5  ;;  %v355_v39 = vshll.u32 %v4342_v3, 16  ;;  %v361_v40 = vshll.u32 %v4350_v18, 16 }
  0x36   : > { %3641 = vmatpush3.bf16.msra.mxu1 %v4214_v4  ;;  %v350_v44 = vsel %vm4256_vm4, %v345_v26, %v349_v57  ;;  %v536_v45 = vor.u32 %v535_v28, %v531_v21  ;;  %v354_v46 = vrot.slane %v352_v33, 4  ;;  %v365_v47 = vshrl.u32 %v4350_v18, 16  ;;  %v4388_v57 = vld [vmem:[%s4211_s11 + $0x8c] sm:$0x1]  ;;  %v4402_v22 = vld [vmem:[%s4211_s11 + $0x34] sm:$0xf] }
  0x37   : > { %v4380_v50 = vcombine.low %v340_v25, %v350_v44  ;;  %v532_v51 = vsel %vm4256_vm4, %v527_v34, %v531_v21  ;;  %v357_v52 = vrot.slane %v355_v39, 5  ;;  %v363_v53 = vrot.slane %v361_v40, 5  ;;  %3918 = vmatprep.subr.msk.bf16.mxu1 %vm760_vm0, %v4358_v24 }
  0x38   : > { %v537_v4 = vrot.slane %v536_v45, 4  ;;  %v367_v55 = vrot.slane %v365_v47, 4  ;;  %v371_v56 = vshll.u32 %v4363_v29, 16  ;;  %v544_v60 = vshrl.u32 %v4371_v41, 16 }
  0x39   : > { %5832 = vst [vmem:[#allocation18_spill] sm:$0xff] %v4380_v50  ;;  %3612 = vmatprep.mubr.msk.bf16.mxu0 %vm711_vm3, %v4380_v50  ;;  %v358_v61 = vor.u32 %v357_v52, %v354_v46  ;;  %v547_v1 = vshll.u32 %v4371_v41, 16  ;;  %v553_v2 = vshll.u32 %v4378_v49, 16  ;;  %v557_v5 = vshrl.u32 %v4378_v49, 16  ;;  %v4413_v46 = vld [vmem:[%s4211_s11 + $0x38] sm:$0x1] }
  0x3a   : > { %v542_v12 = vsel %vm4256_vm4, %v537_v4, %v541_v35  ;;  %v368_v14 = vor.u32 %v367_v55, %v363_v53  ;;  %v373_v20 = vrot.slane %v371_v56, 5  ;;  %v546_v21 = vrot.slane %v544_v60, 4  ;;  %v4418_v52 = vld [vmem:[%s4211_s11 + $0x90] sm:$0xf] }
  0x3b   : > { %v4404_v25 = vcombine.low %v532_v51, %v542_v12  ;;  %v359_v26 = vrot.slane %v358_v61, 4  ;;  %v549_v28 = vrot.slane %v547_v1, 5  ;;  %v555_v33 = vrot.slane %v553_v2, 5  ;;  %v4423_v61 = vld [vmem:[%s4211_s11 + $0x94] sm:$0xf] }
  0x3c   : > { %v369_v34 = vrot.slane %v368_v14, 4  ;;  %v559_v39 = vrot.slane %v557_v5, 4  ;;  %v563_v40 = vshll.u32 %v4388_v57, 16  ;;  %v376_v44 = vshrl.u32 %v4397_v9, 16 }
  0x3d   : > { %5833 = vst [vmem:[#allocation19_spill] sm:$0xff] %v4404_v25  ;;  %3628 = vmatprep.mubr.msk.bf16.mxu1 %vm711_vm3, %v4404_v25  ;;  %v364_v35 = vsel %vm4256_vm4, %v359_v26, %v363_v53  ;;  %v550_v45 = vor.u32 %v549_v28, %v546_v21  ;;  %v379_v47 = vshll.u32 %v4397_v9, 16  ;;  %v385_v51 = vshll.u32 %v4402_v22, 16  ;;  %v4469_v25 = vld [vmem:[%s4211_s11 + $0xa0] sm:$0xf] }
  0x3e   : > { %v374_v4 = vsel %vm4256_vm4, %v369_v34, %v373_v20  ;;  %v560_v55 = vor.u32 %v559_v39, %v555_v33  ;;  %v565_v56 = vrot.slane %v563_v40, 5  ;;  %v378_v60 = vrot.slane %v376_v44, 4  ;;  %v4435_v34 = vld [vmem:[%s4211_s11 + $0x98] sm:$0x1]  ;;  %v4440_v44 = vld [vmem:[%s4211_s11 + $0x3c] sm:$0xf] }
  0x3f   : > { %v4425_v53 = vcombine.low %v364_v35, %v374_v4  ;;  %v551_v1 = vrot.slane %v550_v45, 4  ;;  %v381_v2 = vrot.slane %v379_v47, 5  ;;  %v387_v5 = vrot.slane %v385_v51, 5  ;;  %v4445_v4 = vld [vmem:[%s4211_s11 + $0x40] sm:$0xf] }
  0x40   : > { %v561_v12 = vrot.slane %v560_v55, 4  ;;  %v389_v14 = vshrl.u32 %v4402_v22, 16  ;;  %v395_v21 = vshll.u32 %v4413_v46, 16  ;;  %v568_v20 = vshrl.u32 %v4418_v52, 16 }
  0x41   : > { %5834 = vst [vmem:[#allocation20_spill] sm:$0xff] %v4425_v53  ;;  %3613 = vmatmul.mubr.msk.bf16.gmra.mxu0 %vm711_vm3, %v4425_v53  ;;  %v556_v26 = vsel %vm4256_vm4, %v551_v1, %v555_v33  ;;  %v382_v28 = vor.u32 %v381_v2, %v378_v60  ;;  %v571_v39 = vshll.u32 %v4418_v52, 16  ;;  %v577_v40 = vshll.u32 %v4423_v61, 16 }
  0x42   : > { %v566_v35 = vsel %vm4256_vm4, %v561_v12, %v565_v56  ;;  %v391_v45 = vrot.slane %v389_v14, 4  ;;  %v397_v47 = vrot.slane %v395_v21, 5  ;;  %v570_v51 = vrot.slane %v568_v20, 4  ;;  %v4457_v14 = vld [vmem:[%s4211_s11 + $0x44] sm:$0x1] }
  0x43   : > { %v4447_v33 = vcombine.low %v556_v26, %v566_v35  ;;  %v383_v55 = vrot.slane %v382_v28, 4  ;;  %v573_v60 = vrot.slane %v571_v39, 5  ;;  %v579_v1 = vrot.slane %v577_v40, 5  ;;  %v4462_v26 = vld [vmem:[%s4211_s11 + $0x9c] sm:$0xf] }
  0x44   : > { %v392_v2 = vor.u32 %v391_v45, %v387_v5  ;;  %v581_v36 = vshrl.u32 %v4423_v61, 16  ;;  %v587_v63 = vshll.u32 %v4435_v34, 16  ;;  %v400_v15 = vshrl.u32 %v4440_v44, 16 }
  0x45   : > { %5835 = vst [vmem:[#allocation21_spill] sm:$0xff] %v4447_v33  ;;  %3629 = vmatmul.mubr.msk.bf16.gmra.mxu1 %vm711_vm3, %v4447_v33  ;;  %v388_v56 = vsel %vm4256_vm4, %v383_v55, %v387_v5  ;;  %v574_v12 = vor.u32 %v573_v60, %v570_v51  ;;  %v403_v21 = vshll.u32 %v4440_v44, 16  ;;  %v409_v20 = vshll.u32 %v4445_v4, 16 }
  0x46   : > { %v393_v28 = vrot.slane %v392_v2, 4  ;;  %v583_v39 = vrot.slane %v581_v36, 4  ;;  %v589_v40 = vrot.slane %v587_v63, 5  ;;  %v402_v35 = vrot.slane %v400_v15, 4 }
  0x47   : > { %v575_v45 = vrot.slane %v574_v12, 4  ;;  %v405_v62 = vrot.slane %v403_v21, 5  ;;  %v411_v33 = vrot.slane %v409_v20, 5  ;;  %v413_v5 = vshrl.u32 %v4445_v4, 16  ;;  %v4477_v21 = vld [vmem:[%s4211_s11 + $0xa4] sm:$0x1] }
  0x48   : > { %v398_v51 = vsel %vm4256_vm4, %v393_v28, %v397_v47  ;;  %v584_v55 = vor.u32 %v583_v39, %v579_v1  ;;  %v419_v60 = vshll.u32 %v4457_v14, 16  ;;  %v592_v2 = vshrl.u32 %v4462_v26, 16  ;;  %5837 = vst [vmem:[#allocation23_spill] sm:$0xff] %v4477_v21  ;;  %v4480_v20 = vld [vmem:[%s4211_s11 + $0x48] sm:$0xf] }
  0x49   : > { %v4472_v36 = vcombine.low %v388_v56, %v398_v51  ;;  %v580_v15 = vsel %vm4256_vm4, %v575_v45, %v579_v1  ;;  %v406_v63 = vor.u32 %v405_v62, %v402_v35  ;;  %v415_v12 = vrot.slane %v413_v5, 4 }
  0x4a   : > { %v585_v47 = vrot.slane %v584_v55, 4  ;;  %v421_v28 = vrot.slane %v419_v60, 5  ;;  %v594_v39 = vrot.slane %v592_v2, 4  ;;  %v595_v19 = vshll.u32 %v4462_v26, 16  ;;  %v4491_v55 = vld [vmem:[%s4211_s11 + $0x4c] sm:$0xf] }
  0x4b   : > { %5836 = vst [vmem:[#allocation22_spill] sm:$0xff] %v4472_v36  ;;  %3616 = vmatprep.mubr.msk.bf16.mxu0 %vm711_vm3, %v4472_v36  ;;  %v407_v56 = vrot.slane %v406_v63, 4  ;;  %v416_v51 = vor.u32 %v415_v12, %v411_v33  ;;  %v601_v1 = vshll.u32 %v4469_v25, 16  ;;  %v605_v62 = vshrl.u32 %v4469_v25, 16  ;;  %v4499_v36 = vld [vmem:[%s4211_s11 + $0x50] sm:$0x1] }
  0x4c   : > { %v590_v35 = vsel %vm4256_vm4, %v585_v47, %v589_v40  ;;  %v597_v45 = vrot.slane %v595_v19, 5  ;;  %v611_v5 = vshll.u32 %v4477_v21, 16  ;;  %v424_v60 = vshrl.u32 %v4480_v20, 16  ;;  %v4502_v47 = vld [vmem:[%s4211_s11 + $0xa8] sm:$0xf] }
  0x4d   : > { %v4494_v2 = vcombine.low %v580_v15, %v590_v35  ;;  %v412_v63 = vsel %vm4256_vm4, %v407_v56, %v411_v33  ;;  %v417_v12 = vrot.slane %v416_v51, 4  ;;  %v603_v11 = vrot.slane %v601_v1, 5  ;;  %5839 = vst [vmem:[#allocation25_spill] sm:$0xff] %v4502_v47 }
  0x4e   : > { %v598_v53 = vor.u32 %v597_v45, %v594_v39  ;;  %v607_v50 = vrot.slane %v605_v62, 4  ;;  %v613_v40 = vrot.slane %v611_v5, 5  ;;  %v426_v19 = vrot.slane %v424_v60, 4  ;;  %v4515_v45 = vld [vmem:[%s4211_s11 + $0xac] sm:$0xf] }
  0x4f   : > { %5838 = vst [vmem:[#allocation24_spill] sm:$0xff] %v4494_v2  ;;  %3632 = vmatprep.mubr.msk.bf16.mxu1 %vm711_vm3, %v4494_v2  ;;  %v422_v15 = vsel %vm4256_vm4, %v417_v12, %v421_v28  ;;  %v427_v33 = vshll.u32 %v4480_v20, 16  ;;  %v433_v56 = vshll.u32 %v4491_v55, 16  ;;  %v437_v51 = vshrl.u32 %v4491_v55, 16  ;;  %5841 = vst [vmem:[#allocation27_spill] sm:$0xff] %v4515_v45 }
  0x50   : > { %v4511_v1 = vcombine.low %v412_v63, %v422_v15  ;;  %v599_v39 = vrot.slane %v598_v53, 4  ;;  %v608_v62 = vor.u32 %v607_v50, %v603_v11  ;;  %v443_v35 = vshll.u32 %v4499_v36, 16 }
  0x51   : > { %v429_v5 = vrot.slane %v427_v33, 5  ;;  %v435_v60 = vrot.slane %v433_v56, 5  ;;  %v439_v2 = vrot.slane %v437_v51, 4  ;;  %v616_v28 = vshrl.u32 %v4502_v47, 16  ;;  %v4528_v51 = vld [vmem:[%s4211_s11 + $0x54] sm:$0xf] }
  0x52   : > { %5840 = vst [vmem:[#allocation26_spill] sm:$0xff] %v4511_v1  ;;  %3617 = vmatmul.mubr.msk.bf16.gmra.mxu0 %vm711_vm3, %v4511_v1  ;;  %v604_v53 = vsel %vm4256_vm4, %v599_v39, %v603_v11  ;;  %v609_v50 = vrot.slane %v608_v62, 4  ;;  %v445_v63 = vrot.slane %v443_v35, 5  ;;  %v619_v12 = vshll.u32 %v4502_v47, 16  ;;  %v4535_v62 = vld [vmem:[%s4211_s11 + $0x58] sm:$0xf] }
  0x53   : > { %v430_v15 = vor.u32 %v429_v5, %v426_v19  ;;  %v440_v58 = vor.u32 %v439_v2, %v435_v60  ;;  %v618_v33 = vrot.slane %v616_v28, 4  ;;  %v625_v56 = vshll.u32 %v4515_v45, 16 }
  0x54   : > { %v614_v1 = vsel %vm4256_vm4, %v609_v50, %v613_v40  ;;  %v621_v37 = vrot.slane %v619_v12, 5  ;;  %v629_v11 = vshrl.u32 %v4515_v45, 16  ;;  %v635_v39 = vshll.u32 %v4518_v38, 16 }
  0x55   : > { %v4537_v2 = vcombine.low %v604_v53, %v614_v1  ;;  %v431_v19 = vrot.slane %v430_v15, 4  ;;  %v441_v35 = vrot.slane %v440_v58, 4  ;;  %v627_v5 = vrot.slane %v625_v56, 5 }
  0x56   : > { %v622_v28 = vor.u32 %v621_v37, %v618_v33  ;;  %v631_v0 = vrot.slane %v629_v11, 4  ;;  %v637_v54 = vrot.slane %v635_v39, 5  ;;  %v448_v40 = vshrl.u32 %v4528_v51, 16  ;;  %v4552_v37 = vld [vmem:[%s4211_s11 + $0xb4] sm:$0xf] }
  0x57   : > { %5843 = vst [vmem:[#allocation29_spill] sm:$0xff] %v4537_v2  ;;  %3633 = vmatmul.mubr.msk.bf16.gmra.mxu1 %vm711_vm3, %v4537_v2  ;;  %v436_v50 = vsel %vm4256_vm4, %v431_v19, %v435_v60  ;;  %v446_v1 = vsel %vm4256_vm4, %v441_v35, %v445_v63  ;;  %v451_v58 = vshll.u32 %v4528_v51, 16  ;;  %v457_v53 = vshll.u32 %v4535_v62, 16  ;;  %5844 = vst [vmem:[#allocation30_spill] sm:$0xff] %v4552_v37  ;;  %v4557_v11 = vld [vmem:[%s4211_s11 + $0xb8] sm:$0xf] }
  0x58   : > { %v4554_v12 = vcombine.low %v436_v50, %v446_v1  ;;  %v623_v15 = vrot.slane %v622_v28, 4  ;;  %v632_v33 = vor.u32 %v631_v0, %v627_v5  ;;  %v450_v56 = vrot.slane %v448_v40, 4 }
  0x59   : > { %v453_v39 = vrot.slane %v451_v58, 5  ;;  %v459_v2 = vrot.slane %v457_v53, 5  ;;  %v461_v60 = vshrl.u32 %v4535_v62, 16  ;;  %v467_v63 = vshll.u32 %v4540_v48, 16  ;;  %v4568_v58 = vld [vmem:[%s4211_s11 + $0xbc] sm:$0x1] }
  0x5a   : > { %5845 = vst [vmem:[#allocation31_spill] sm:$0xff] %v4554_v12  ;;  %3620 = vmatprep.mubr.msk.bf16.mxu0 %vm711_vm3, %v4554_v12  ;;  %v628_v19 = vsel %vm4256_vm4, %v623_v15, %v627_v5  ;;  %v633_v35 = vrot.slane %v632_v33, 4  ;;  %v640_v28 = vshrl.u32 %v4552_v37, 16  ;;  %v643_v0 = vshll.u32 %v4552_v37, 16 }
  0x5b   : > { %v454_v40 = vor.u32 %v453_v39, %v450_v56  ;;  %v463_v50 = vrot.slane %v461_v60, 4  ;;  %v469_v1 = vrot.slane %v467_v63, 5  ;;  %v649_v53 = vshll.u32 %v4557_v11, 16 }
  0x5c   : > { %v638_v38 = vsel %vm4256_vm4, %v633_v35, %v637_v54  ;;  %v642_v47 = vrot.slane %v640_v28, 4  ;;  %v645_v12 = vrot.slane %v643_v0, 5  ;;  %v653_v45 = vshrl.u32 %v4557_v11, 16 }
  0x5d   : > { %v4574_v5 = vcombine.low %v628_v19, %v638_v38  ;;  %v455_v15 = vrot.slane %v454_v40, 4  ;;  %v464_v33 = vor.u32 %v463_v50, %v459_v2  ;;  %v651_v21 = vrot.slane %v649_v53, 5 }
  0x5e   : > { %v646_v37 = vor.u32 %v645_v12, %v642_v47  ;;  %v655_v56 = vrot.slane %v653_v45, 4  ;;  %v659_v39 = vshll.u32 %v4568_v58, 16  ;;  %v3293_v54 = vrot.slane %v4220_v6, 9 }
  0x5f   : > { %3636 = vmatprep.mubr.msk.bf16.mxu1 %vm711_vm3, %v4574_v5  ;;  %v460_v38 = vsel %vm4256_vm4, %v455_v15, %v459_v2  ;;  %v465_v63 = vrot.slane %v464_v33, 4  ;;  %v1238_v47 = vrot.slane %v4223_v7, 5  ;;  %v4591_v45 = vcombine.low %v4249_v30, %v4252_v31 }
  0x60   : > { %v647_v12 = vrot.slane %v646_v37, 4  ;;  %v656_v19 = vor.u32 %v655_v56, %v651_v21  ;;  %v661_v35 = vrot.slane %v659_v39, 5  ;;  %v3294_v28 = vrot.slane %v4249_v30, 9 }
  0x61   : > { %v470_v0 = vsel %vm4256_vm4, %v465_v63, %v469_v1  ;;  %v1239_v40 = vsel %vm4579_vm7, %v3293_v54, %v1238_v47  ;;  %v1240_v50 = vrot.slane %v1238_v47, 4  ;;  %v5848_v2 = vrot.slane %v4252_v31, 5 }
  0x62   : > { %v4600_v15 = vcombine.low %v460_v38, %v470_v0  ;;  %v652_v33 = vsel %vm4256_vm4, %v647_v12, %v651_v21  ;;  %v657_v37 = vrot.slane %v656_v19, 4  ;;  %v5850_v1 = vrot.slane %v4226_v8, 5 }
  0x63   : > { %v1247_v53 = vrot.slane %v5848_v2, 4  ;;  %v5849_v56 = vmov %v5848_v2  ;;  %v5851_v54 = vrot.slane %v4263_v42, 5  ;;  %v4618_v63 = vcombine.low %v4292_v10, %v4301_v23 }
  0x64   : > { %v1246_v30 = vsel %vm4579_vm7, %v3294_v28, %v5849_v56  ;;  %v1242_v39 = vsel %vm4579_vm7, %v1240_v50, %v5850_v1  ;;  %v3295_v21 = vrot.slane %v4292_v10, 9  ;;  %3621 = vmatmul.mubr.msk.bf16.gmra.mxu0 %vm711_vm3, %v4600_v15  ;;  %v662_v8 = vsel %vm4256_vm4, %v657_v37, %v661_v35 }
  0x65   : > { %v1249_v38 = vsel %vm4579_vm7, %v1247_v53, %v5851_v54  ;;  %v3309_v31 = vcombine.low %v1239_v40, %v1242_v39  ;;  %v1252_v42 = vrot.slane %v4301_v23, 5  ;;  %v4628_v12 = vcombine.low %v652_v33, %v662_v8 }
  0x66   : > { %v4625_v47 = vcombine.low %v1246_v30, %v1249_v38  ;;  %v1255_v19 = vrot.slane %v4308_v27, 5  ;;  %v1259_v0 = vrot.slane %v4350_v18, 5  ;;  %v3296_v35 = vrot.slane %v4342_v3, 9 }
  0x67   : > { %5852 = vst [vmem:[#allocation32_spill] sm:$0xff] %v4628_v12  ;;  %3676 = vmatprep.mubr.msk.bf16.mxu0 %vm711_vm3, %v3309_v31  ;;  %v1253_v10 = vsel %vm4579_vm7, %v3295_v21, %v1252_v42  ;;  %v1254_v28 = vrot.slane %v1252_v42, 4  ;;  %3637 = vmatmul.mubr.msk.bf16.gmra.mxu1 %vm711_vm3, %v4628_v12  ;;  %v3297_v40 = vrot.slane %v4397_v9, 9  ;;  %v1266_v23 = vrot.slane %v4402_v22, 5 }
  0x68   : > { %v5853_v27 = vcombine.low %v4220_v6, %v4223_v7  ;;  %v1261_v2 = vrot.slane %v1259_v0, 4  ;;  %v1262_v53 = vrot.slane %v4363_v29, 5  ;;  %v1269_v33 = vrot.slane %v4413_v46, 5  ;;  %v4663_v46 = vld [vmem:[%s5772_s1 + $0xc] sm:$0x3] }
  0x69   : > { %v1256_v50 = vsel %vm4579_vm7, %v1254_v28, %v1255_v19  ;;  %v1268_v56 = vrot.slane %v1266_v23, 4  ;;  %v1875_v30 = vsel %vm760_vm0, %v4323_v43, 0  ;;  %v1273_v1 = vrot.slane %v4445_v4, 5  ;;  %v4680_v19 = vld [vmem:[%s5772_s1 + $0xa] sm:$0x3] }
  0x6a   : > { %3642 = vmatprep.mubr.msk.bf16.mxu1 %vm711_vm3, %v5853_v27  ;;  %v4648_v37 = vcombine.low %v1253_v10, %v1256_v50  ;;  %v1649_v6 = vsel %vm760_vm0, %v4358_v24, 0  ;;  %v1260_v7 = vsel %vm4579_vm7, %v3296_v35, %v1259_v0  ;;  %v1267_v39 = vsel %vm4579_vm7, %v3297_v40, %v1266_v23 }
  0x6b   : > { %v1280_v29 = vrot.slane %v4491_v55, 5  ;;  %v1263_v43 = vsel %vm4579_vm7, %v1261_v2, %v1262_v53  ;;  %v1270_v24 = vsel %vm4579_vm7, %v1268_v56, %v1269_v33  ;;  %v3298_v54 = vrot.slane %v4440_v44, 9 }
  0x6c   : > { %3677 = vmatmul.mubr.msk.bf16.vlgmr.msra.gmra.mxu0 %vm711_vm3, %v4625_v47  ;;  %v1276_v38 = vrot.slane %v4457_v14, 5  ;;  %v1275_v21 = vrot.slane %v1273_v1, 4  ;;  %v3299_v8 = vrot.slane %v4480_v20, 9  ;;  %v1283_v42 = vrot.slane %v4499_v36, 5 }
  0x6d   : > { %3743 = vmatpush3.bf16.msra.mxu0 %v1875_v30  ;;  %3680 = vmatprep.mubr.msk.bf16.mxu0 %vm711_vm3, %v4648_v37  ;;  %v1282_v31 = vrot.slane %v1280_v29, 4  ;;  %v4688_v14 = vcombine.low %v1260_v7, %v1263_v43  ;;  %v4690_v10 = vcombine.low %v1267_v39, %v1270_v24  ;;  %v1274_v36 = vsel %vm4579_vm7, %v3298_v54, %v1273_v1 }
  0x6e   : > { %3921 = vmatprep.subr.msk.bf16.mxu0 %vm760_vm0, %v4663_v46  ;;  %v1277_v28 = vsel %vm4579_vm7, %v1275_v21, %v1276_v38  ;;  %v1281_v0 = vsel %vm4579_vm7, %v3299_v8, %v1280_v29  ;;  %v1287_v40 = vrot.slane %v4535_v62, 5  ;;  %v1297_v23 = vrot.slane %v4241_v17, 5  ;;  %v5854_v8 = vld [vmem:[#allocation23_spill] sm:$0xff] }
  0x6f   : > { %3643 = vmatmul.mubr.msk.bf16.vlgmr.msra.gmra.mxu1 %vm711_vm3, %v4591_v45  ;;  %v1284_v35 = vsel %vm4579_vm7, %v1282_v31, %v1283_v42  ;;  %v3300_v27 = vrot.slane %v4528_v51, 9  ;;  %v3301_v50 = vrot.slane %v4233_v13, 9  ;;  %v1294_v2 = vrot.slane %v4238_v16, 5  ;;  %v5855_v42 = vld [vmem:[#allocation27_spill] sm:$0xff] }
  0x70   : > { %3709 = vmatpush3.bf16.msra.mxu1 %v1649_v6  ;;  %3646 = vmatprep.mubr.msk.bf16.mxu1 %vm711_vm3, %v4618_v63  ;;  %v4709_v53 = vcombine.low %v4342_v3, %v4350_v18  ;;  %v4713_v33 = vcombine.low %v4397_v9, %v4402_v22  ;;  %v4717_v56 = vcombine.low %v4440_v44, %v4445_v4  ;;  %v1290_v3 = vrot.slane %v4540_v48, 5 }
  0x71   : > { %3920 = vmatprep.subr.msk.bf16.mxu1 %vm760_vm0, %v4680_v19  ;;  %v4721_v17 = vcombine.low %v4480_v20, %v4491_v55  ;;  %v4725_v30 = vcombine.low %v1274_v36, %v1277_v28  ;;  %v4727_v1 = vcombine.low %v1281_v0, %v1284_v35  ;;  %v4732_v18 = vcombine.low %v4371_v41, %v4378_v49  ;;  %v5856_v36 = vld [vmem:[#allocation25_spill] sm:$0xff] }
  0x72   : > { %v1289_v9 = vrot.slane %v1287_v40, 4  ;;  %v3304_v22 = vrot.slane %v4371_v41, 9  ;;  %v1315_v44 = vrot.slane %v4378_v49, 5  ;;  %v1318_v4 = vrot.slane %v4388_v57, 5 }
  0x73   : > { %v1288_v20 = vsel %vm4579_vm7, %v3300_v27, %v1287_v40  ;;  %v1295_v48 = vsel %vm4579_vm7, %v3301_v50, %v1294_v2  ;;  %v1296_v55 = vrot.slane %v1294_v2, 4  ;;  %v4745_v6 = vcombine.low %v4418_v52, %v4423_v61  ;;  %v5857_v40 = vld [vmem:[#allocation28_spill] sm:$0xff] }
  0x74   : > { %3681 = vmatmul.mubr.msk.bf16.gmra.mxu0 %vm711_vm3, %v4688_v14  ;;  %v1316_v41 = vsel %vm4579_vm7, %v3304_v22, %v1315_v44  ;;  %v1317_v49 = vrot.slane %v1315_v44, 4  ;;  %v3305_v57 = vrot.slane %v4418_v52, 9  ;;  %v1322_v7 = vrot.slane %v4423_v61, 5 }
  0x75   : > { %3684 = vmatprep.mubr.msk.bf16.mxu0 %vm711_vm3, %v4690_v10  ;;  %v1301_v39 = vrot.slane %v4278_v59, 5  ;;  %v1325_v29 = vrot.slane %v4435_v34, 5  ;;  %v4759_v43 = vcombine.low %v4462_v26, %v4469_v25  ;;  %v3306_v24 = vrot.slane %v4462_v26, 9 }
  0x76   : > { %v1291_v54 = vsel %vm4579_vm7, %v1289_v9, %v1290_v3  ;;  %v1319_v52 = vsel %vm4579_vm7, %v1317_v49, %v1318_v4  ;;  %v1323_v61 = vsel %vm4579_vm7, %v3305_v57, %v1322_v7  ;;  %v1324_v38 = vrot.slane %v1322_v7, 4  ;;  %v5858_v3 = vld [vmem:[#allocation30_spill] sm:$0xff]  ;;  %v5859_v57 = vld [vmem:[#allocation15_spill] sm:$0xff] }
  0x77   : > { %3647 = vmatmul.mubr.msk.bf16.gmra.mxu1 %vm711_vm3, %v4709_v53  ;;  %v4768_v21 = vcombine.low %v1316_v41, %v1319_v52  ;;  %v1329_v34 = vrot.slane %v4469_v25, 5  ;;  %v1332_v31 = vrot.slane %v5854_v8, 5  ;;  %v4774_v28 = vcombine.low %v5856_v36, %v5855_v42 }
  0x78   : > { %3650 = vmatprep.mubr.msk.bf16.mxu1 %vm711_vm3, %v4713_v33  ;;  %v1326_v26 = vsel %vm4579_vm7, %v1324_v38, %v1325_v29  ;;  %v3307_v0 = vrot.slane %v5856_v36, 9  ;;  %v1336_v35 = vrot.slane %v5855_v42, 5  ;;  %v1339_v27 = vrot.slane %v5857_v40, 5  ;;  %v5861_v42 = vld [vmem:[#allocation11_spill] sm:$0xff] }
  0x79   : > { %v4783_v50 = vcombine.low %v1323_v61, %v1326_v26  ;;  %v1330_v25 = vsel %vm4579_vm7, %v3306_v24, %v1329_v34  ;;  %v1331_v2 = vrot.slane %v1329_v34, 4  ;;  %v4789_v9 = vcombine.low %v5858_v3, %v4557_v11 }
  0x7a   : > { %v1337_v22 = vsel %vm4579_vm7, %v3307_v0, %v1336_v35  ;;  %v1338_v44 = vrot.slane %v1336_v35, 4  ;;  %v3308_v4 = vrot.slane %v5858_v3, 9  ;;  %v1343_v41 = vrot.slane %v4557_v11, 5  ;;  %v5862_v0 = vld [vmem:[#allocation13_spill] sm:$0xff] }
  0x7b   : > { %v1298_v49 = vsel %vm4579_vm7, %v1296_v55, %v1297_v23  ;;  %v1308_v7 = vrot.slane %v5859_v57, 5  ;;  %v1333_v29 = vsel %vm4579_vm7, %v1331_v2, %v1332_v31  ;;  %v1346_v24 = vrot.slane %v4568_v58, 5  ;;  %v5860_v55 = vld [vmem:[#allocation10_spill] sm:$0xff] }
  0x7c   : > { %3685 = vmatmul.mubr.msk.bf16.gmra.mxu0 %vm711_vm3, %v4725_v30  ;;  %v4805_v52 = vcombine.low %v1330_v25, %v1333_v29  ;;  %v1340_v61 = vsel %vm4579_vm7, %v1338_v44, %v1339_v27  ;;  %v1344_v11 = vsel %vm4579_vm7, %v3308_v4, %v1343_v41  ;;  %v1345_v38 = vrot.slane %v1343_v41, 4  ;;  %v5863_v27 = vld [vmem:[#allocation16_spill] sm:$0xff]  ;;  %v263_v41 = vld [vmem:[%s4211_s11 + $0xc8] sm:$0x1] }
  0x7d   : > { %3688 = vmatprep.mubr.msk.bf16.mxu0 %vm711_vm3, %v4727_v1  ;;  %v4813_v23 = vcombine.low %v1288_v20, %v1291_v54  ;;  %v3302_v34 = vrot.slane %v5860_v55, 9  ;;  %v4816_v58 = vcombine.low %v1337_v22, %v1340_v61  ;;  %v4818_v8 = vcombine.low %v1295_v48, %v1298_v49  ;;  %v4892_v4 = vld [vmem:[%s4211_s11 + $0xc0] sm:$0xf]  ;;  %v5864_v61 = vld [vmem:[#allocation14_spill] sm:$0xff] }
  0x7e   : > { %v1303_v31 = vrot.slane %v1301_v39, 4  ;;  %v1304_v36 = vrot.slane %v5861_v42, 5  ;;  %v1347_v26 = vsel %vm4579_vm7, %v1345_v38, %v1346_v24  ;;  %v3303_v35 = vrot.slane %v5862_v0, 9  ;;  %v5866_v42 = vld [vmem:[#allocation20_spill] sm:$0xff] }
  0x7f   : > { %3651 = vmatmul.mubr.msk.bf16.gmra.mxu1 %vm711_vm3, %v4717_v56  ;;  %v1310_v40 = vrot.slane %v1308_v7, 4  ;;  %v1311_v25 = vrot.slane %v5863_v27, 5  ;;  %v4825_v2 = vcombine.low %v1344_v11, %v1347_v26  ;;  %v4829_v20 = vcombine.low %v4528_v51, %v4535_v62  ;;  %v5870_v26 = vld [vmem:[#allocation12_spill] sm:$0xff] }
  0x80   : > { %3654 = vmatprep.mubr.msk.bf16.mxu1 %vm711_vm3, %v4721_v17  ;;  %v4835_v48 = vcombine.low %v4233_v13, %v4238_v16  ;;  %v1302_v54 = vsel %vm4579_vm7, %v3302_v34, %v1301_v39  ;;  %v1305_v3 = vsel %vm4579_vm7, %v1303_v31, %v1304_v36  ;;  %v1309_v51 = vsel %vm4579_vm7, %v3303_v35, %v1308_v7  ;;  %v5865_v34 = vld [vmem:[#allocation18_spill] sm:$0xff]  ;;  %v5869_v36 = vld [vmem:[#allocation31_spill] sm:$0xff] }
  0x81   : > { %v1312_v62 = vsel %vm4579_vm7, %v1310_v40, %v1311_v25  ;;  %v4851_v13 = vcombine.low %v1302_v54, %v1305_v3  ;;  %v4857_v39 = vcombine.low %v5860_v55, %v4278_v59  ;;  %v4863_v22 = vcombine.low %v5862_v0, %v5859_v57  ;;  %v4886_v59 = vld [vmem:[%s4211_s11 + $0xc4] sm:$0xf]  ;;  %v275_v55 = vld [vmem:[%s5772_s1 + $0x10] sm:$0x3]  ;;  %v5872_v35 = vld [vmem:[#allocation19_spill] sm:$0xff] }
  0x82   : > { %v4853_v16 = vcombine.low %v1309_v51, %v1312_v62  ;;  %v2073_v44 = vrot.slane %v4886_v59, 5  ;;  %v3375_v49 = vrot.slane %v4892_v4, 9  ;;  %v2076_v7 = vrot.slane %v263_v41, 5  ;;  %v5871_v0 = vld [vmem:[#allocation17_spill] sm:$0xff] }
  0x83   : > { %v2289_v38 = vsel %vm760_vm0, %v4663_v46, 0  ;;  %v2085_v31 = vsel %vm760_vm0, %v4680_v19, 0  ;;  %v5867_v46 = vld [vmem:[#allocation22_spill] sm:$0xff]  ;;  %v5873_v40 = vld [vmem:[#allocation21_spill] sm:$0xff]  ;;  %v1845_v27 = vshrl.u32 %v4892_v4, 16  ;;  %v1848_v25 = vshll.u32 %v4892_v4, 16 }
  0x84   : > { %3689 = vmatmul.mubr.msk.bf16.gmra.mxu0 %vm711_vm3, %v4813_v23  ;;  %v2075_v57 = vrot.slane %v2073_v44, 4  ;;  %v2074_v29 = vsel %vm4579_vm7, %v3375_v49, %v2073_v44  ;;  %v5868_v19 = vld [vmem:[#allocation26_spill] sm:$0xff]  ;;  %v1858_v54 = vshrl.u32 %v4886_v59, 16  ;;  %v1854_v3 = vshll.u32 %v4886_v59, 16 }
  0x85   : > { %3692 = vmatprep.mubr.msk.bf16.mxu0 %vm711_vm3, %v4818_v8  ;;  %v1847_v51 = vrot.slane %v1845_v27, 4  ;;  %v1850_v62 = vrot.slane %v1848_v25, 5 }
  0x86   : > { %v2077_v24 = vsel %vm4579_vm7, %v2075_v57, %v2076_v7  ;;  %v1856_v44 = vrot.slane %v1854_v3, 5  ;;  %v1860_v49 = vrot.slane %v1858_v54, 4  ;;  %v5874_v57 = vld [vmem:[#allocation24_spill] sm:$0xff]  ;;  %v5875_v7 = vld [vmem:[#allocation29_spill] sm:$0xff]  ;;  %v3341_v3 = vcombine.low %v4892_v4, %v4886_v59 }
  0x87   : > { %3655 = vmatmul.mubr.msk.bf16.gmra.mxu1 %vm711_vm3, %v4829_v20  ;;  %v4904_v11 = vcombine.low %v2074_v29, %v2077_v24  ;;  %v1851_v29 = vor.u32 %v1850_v62, %v1847_v51  ;;  %v2725_v51 = vsel %vm760_vm0, %v275_v55, 0 }
  0x88   : > { %3658 = vmatprep.mubr.msk.bf16.mxu1 %vm711_vm3, %v4835_v48  ;;  %v1861_v24 = vor.u32 %v1860_v49, %v1856_v44 }
  0x8c   : > { %3693 = vmatmul.mubr.msk.bf16.gmra.mxu0 %vm711_vm3, %v4851_v13 }
  0x8d   : > { %3696 = vmatprep.mubr.msk.bf16.mxu0 %vm711_vm3, %v4853_v16 }
  0x8f   : > { %3659 = vmatmul.mubr.msk.bf16.gmra.mxu1 %vm711_vm3, %v4857_v39 }
  0x90   : > { %3662 = vmatprep.mubr.msk.bf16.mxu1 %vm711_vm3, %v4863_v22 }
  0x94   : > { %3697 = vmatmul.mubr.msk.bf16.gmra.mxu0 %vm711_vm3, %v4768_v21 }
  0x95   : > { %3700 = vmatprep.mubr.msk.bf16.mxu0 %vm711_vm3, %v4783_v50 }
  0x97   : > { %3663 = vmatmul.mubr.msk.bf16.gmra.mxu1 %vm711_vm3, %v4732_v18 }
  0x98   : > { %3666 = vmatprep.mubr.msk.bf16.mxu1 %vm711_vm3, %v4745_v6 }
  0x9c   : > { %3701 = vmatmul.mubr.msk.bf16.gmra.mxu0 %vm711_vm3, %v4805_v52 }
  0x9d   : > { %3704 = vmatprep.mubr.msk.bf16.mxu0 %vm711_vm3, %v4816_v58 }
  0x9f   : > { %3667 = vmatmul.mubr.msk.bf16.gmra.mxu1 %vm711_vm3, %v4759_v43 }
  0xa0   : > { %3670 = vmatprep.mubr.msk.bf16.mxu1 %vm711_vm3, %v4774_v28 }
  0xa4   : > { %3705 = vmatmul.mubr.msk.bf16.gmra.mxu0 %vm711_vm3, %v4825_v2 }
  0xa5   : > { %3744 = vmatprep.mubr.msk.bf16.mxu0 %vm711_vm3, %v5864_v61  ;;  %v1864_v61 = vshll.u32 %v263_v41, 16 }
  0xa7   : > { %3671 = vmatmul.mubr.msk.bf16.gmra.mxu1 %vm711_vm3, %v4789_v9  ;;  %v1866_v27 = vrot.slane %v1864_v61, 5  ;;  %v5096_v61 = vld [vmem:[%s4211_s11 + $0xd0] sm:$0xf] }
  0xa8   : > { %3710 = vmatprep.mubr.msk.bf16.mxu1 %vm711_vm3, %v4591_v45  ;;  %v274_v45 = vld [vmem:[%s5772_s1 + $0xe] sm:$0x3] }
  0xa9   : > { %v2515_v62 = vsel %vm760_vm0, %v274_v45, 0 }
  0xac   : > { %3745 = vmatmul.mubr.msk.bf16.vlgmr.msra.gmra.mxu0 %vm711_vm3, %v5865_v34 }
  0xad   : > { %3811 = vmatpush3.bf16.msra.mxu0 %v2289_v38  ;;  %3748 = vmatprep.mubr.msk.bf16.mxu0 %vm711_vm3, %v5866_v42  ;;  %v1852_v38 = vrot.slane %v1851_v29, 4 }
  0xae   : > { %3923 = vmatprep.subr.msk.bf16.mxu0 %vm760_vm0, %v275_v55 }
  0xaf   : > { %3711 = vmatmul.mubr.msk.bf16.vlgmr.msra.gmra.mxu1 %vm711_vm3, %v4618_v63  ;;  %v1857_v25 = vsel %vm4256_vm4, %v1852_v38, %v1856_v44 }
  0xb0   : > { %3777 = vmatpush3.bf16.msra.mxu1 %v2085_v31  ;;  %3714 = vmatprep.mubr.msk.bf16.mxu1 %vm711_vm3, %v4709_v53  ;;  %v1862_v31 = vrot.slane %v1861_v24, 4 }
  0xb1   : > { %3922 = vmatprep.subr.msk.bf16.mxu1 %vm760_vm0, %v274_v45 }
  0xb2   : > { %v1867_v41 = vsel %vm4256_vm4, %v1862_v31, %v1866_v27 }
  0xb3   : > { %v4986_v54 = vcombine.low %v1857_v25, %v1867_v41 }
  0xb4   : > { %3749 = vmatmul.mubr.msk.bf16.gmra.mxu0 %vm711_vm3, %v5867_v46 }
  0xb5   : > { %3752 = vmatprep.mubr.msk.bf16.mxu0 %vm711_vm3, %v5868_v19  ;;  %5876 = vst [vmem:[#allocation23_spill] sm:$0xff] %v4986_v54 }
  0xb7   : > { %3715 = vmatmul.mubr.msk.bf16.gmra.mxu1 %vm711_vm3, %v4713_v33 }
  0xb8   : > { %3718 = vmatprep.mubr.msk.bf16.mxu1 %vm711_vm3, %v4717_v56 }
  0xbc   : > { %3753 = vmatmul.mubr.msk.bf16.gmra.mxu0 %vm711_vm3, %v5869_v36 }
  0xbd   : > { %3756 = vmatprep.mubr.msk.bf16.mxu0 %vm711_vm3, %v4600_v15 }
  0xbf   : > { %3719 = vmatmul.mubr.msk.bf16.gmra.mxu1 %vm711_vm3, %v4721_v17 }
  0xc0   : > { %3722 = vmatprep.mubr.msk.bf16.mxu1 %vm711_vm3, %v4829_v20 }
  0xc4   : > { %3757 = vmatmul.mubr.msk.bf16.gmra.mxu0 %vm711_vm3, %v5870_v26 }
  0xc5   : > { %3760 = vmatprep.mubr.msk.bf16.mxu0 %vm711_vm3, %v5871_v0 }
  0xc7   : > { %3723 = vmatmul.mubr.msk.bf16.gmra.mxu1 %vm711_vm3, %v4835_v48 }
  0xc8   : > { %3726 = vmatprep.mubr.msk.bf16.mxu1 %vm711_vm3, %v4857_v39 }
  0xcc   : > { %3761 = vmatmul.mubr.msk.bf16.gmra.mxu0 %vm711_vm3, %v5872_v35 }
  0xcd   : > { %3764 = vmatprep.mubr.msk.bf16.mxu0 %vm711_vm3, %v5873_v40 }
  0xcf   : > { %3727 = vmatmul.mubr.msk.bf16.gmra.mxu1 %vm711_vm3, %v4863_v22 }
  0xd0   : > { %3730 = vmatprep.mubr.msk.bf16.mxu1 %vm711_vm3, %v4732_v18 }
  0xd4   : > { %3765 = vmatmul.mubr.msk.bf16.gmra.mxu0 %vm711_vm3, %v5874_v57 }
  0xd5   : > { %3768 = vmatprep.mubr.msk.bf16.mxu0 %vm711_vm3, %v5875_v7 }
  0xd7   : > { %3731 = vmatmul.mubr.msk.bf16.gmra.mxu1 %vm711_vm3, %v4745_v6 }
  0xd8   : > { %3734 = vmatprep.mubr.msk.bf16.mxu1 %vm711_vm3, %v4759_v43 }
  0xdc   : > { %3769 = vmatmul.mubr.msk.bf16.gmra.mxu0 %vm711_vm3, %v4574_v5 }
  0xdd   : > { %3772 = vmatprep.mubr.msk.bf16.mxu0 %vm711_vm3, %v4628_v12 }
  0xdf   : > { %3735 = vmatmul.mubr.msk.bf16.gmra.mxu1 %vm711_vm3, %v4774_v28 }
  0xe0   : > { %3738 = vmatprep.mubr.msk.bf16.mxu1 %vm711_vm3, %v4789_v9 }
  0xe4   : > { %3773 = vmatmul.mubr.msk.bf16.gmra.mxu0 %vm711_vm3, %v4986_v54 }
  0xe5   : > { %3812 = vmatprep.mubr.msk.bf16.mxu0 %vm711_vm3, %v4618_v63 }
  0xe7   : > { %3739 = vmatmul.mubr.msk.bf16.gmra.mxu1 %vm711_vm3, %v3341_v3 }
  0xe8   : > { %3778 = vmatprep.mubr.msk.bf16.mxu1 %vm711_vm3, %v4625_v47 }
  0xec   : > { %3813 = vmatmul.mubr.msk.bf16.vlgmr.msra.gmra.mxu0 %vm711_vm3, %v4709_v53 }
  0xed   : > { %3879 = vmatpush3.bf16.msra.mxu0 %v2725_v51  ;;  %3816 = vmatprep.mubr.msk.bf16.mxu0 %vm711_vm3, %v4713_v33 }
  0xef   : > { %3779 = vmatmul.mubr.msk.bf16.vlgmr.msra.gmra.mxu1 %vm711_vm3, %v4648_v37 }
  0xf0   : > { %3845 = vmatpush3.bf16.msra.mxu1 %v2515_v62  ;;  %3782 = vmatprep.mubr.msk.bf16.mxu1 %vm711_vm3, %v4688_v14  ;;  %v5009_v63 = vpop.f32.mrf.mxu0 }
  0xf2   : > { %v5019_v53 = vpop.f32.mrf.mxu0 }
  0xf4   : > { %3817 = vmatmul.mubr.msk.bf16.gmra.mxu0 %vm711_vm3, %v4717_v56  ;;  %v5025_v56 = vpop.f32.mrf.mxu0 }
  0xf5   : > { %3820 = vmatprep.mubr.msk.bf16.mxu0 %vm711_vm3, %v4721_v17  ;;  %v5015_v47 = vpop.f32.mrf.mxu1 }
  0xf6   : > { %v5035_v59 = vpop.f32.mrf.mxu0 }
  0xf7   : > { %3783 = vmatmul.mubr.msk.bf16.gmra.mxu1 %vm711_vm3, %v4690_v10  ;;  %v5021_v33 = vpop.f32.mrf.mxu1 }
  0xf8   : > { %3786 = vmatprep.mubr.msk.bf16.mxu1 %vm711_vm3, %v4725_v30 }
  0xf9   : > { %v5031_v17 = vpop.f32.mrf.mxu1 }
  0xfb   : > { %v5037_v4 = vpop.f32.mrf.mxu1 }
  0xfc   : > { %3821 = vmatmul.mubr.msk.bf16.gmra.mxu0 %vm711_vm3, %v4829_v20 }
  0xfd   : > { %3824 = vmatprep.mubr.msk.bf16.mxu0 %vm711_vm3, %v4835_v48 }
  0xff   : > { %3787 = vmatmul.mubr.msk.bf16.gmra.mxu1 %vm711_vm3, %v4727_v1 }
 0x100   : > { %3790 = vmatprep.mubr.msk.bf16.mxu1 %vm711_vm3, %v4813_v23 }
 0x101   : > { %v5041_v20 = vpop.f32.mrf.mxu0 }
 0x103   : > { %v5051_v55 = vpop.f32.mrf.mxu0 }
 0x104   : > { %3825 = vmatmul.mubr.msk.bf16.gmra.mxu0 %vm711_vm3, %v4857_v39 }
 0x105   : > { %3828 = vmatprep.mubr.msk.bf16.mxu0 %vm711_vm3, %v4863_v22  ;;  %v5047_v48 = vpop.f32.mrf.mxu1  ;;  %v5057_v39 = vpop.f32.mrf.mxu0 }
 0x107   : > { %3791 = vmatmul.mubr.msk.bf16.gmra.mxu1 %vm711_vm3, %v4818_v8  ;;  %v5053_v45 = vpop.f32.mrf.mxu1  ;;  %v5067_v44 = vpop.f32.mrf.mxu0 }
 0x108   : > { %3794 = vmatprep.mubr.msk.bf16.mxu1 %vm711_vm3, %v4851_v13 }
 0x109   : > { %v5063_v22 = vpop.f32.mrf.mxu1 }
 0x10b   : > { %v5069_v49 = vpop.f32.mrf.mxu1 }
 0x10c   : > { %3829 = vmatmul.mubr.msk.bf16.gmra.mxu0 %vm711_vm3, %v4732_v18 }
 0x10d   : > { %3832 = vmatprep.mubr.msk.bf16.mxu0 %vm711_vm3, %v4745_v6 }
 0x10f   : > { %3795 = vmatmul.mubr.msk.bf16.gmra.mxu1 %vm711_vm3, %v4853_v16 }
 0x110   : > { %3798 = vmatprep.mubr.msk.bf16.mxu1 %vm711_vm3, %v4768_v21 }
 0x112   : > { %v5073_v18 = vpop.f32.mrf.mxu0 }
 0x114   : > { %3833 = vmatmul.mubr.msk.bf16.gmra.mxu0 %vm711_vm3, %v4759_v43  ;;  %v5083_v29 = vpop.f32.mrf.mxu0 }
 0x115   : > { %3836 = vmatprep.mubr.msk.bf16.mxu0 %vm711_vm3, %v4774_v28  ;;  %v5093_v28 = vld [vmem:[%s4211_s11 + $0xcc] sm:$0xf] }
 0x116   : > { %v5089_v43 = vpop.f32.mrf.mxu0 }
 0x117   : > { %3799 = vmatmul.mubr.msk.bf16.gmra.mxu1 %vm711_vm3, %v4783_v50  ;;  %v5079_v6 = vpop.f32.mrf.mxu1 }
 0x118   : > { %5877 = vst [vmem:[#allocation27_spill] sm:$0xff] %v5079_v6  ;;  %3802 = vmatprep.mubr.msk.bf16.mxu1 %vm711_vm3, %v4805_v52  ;;  %v5102_v31 = vpop.f32.mrf.mxu0 }
 0x119   : > { %v5085_v24 = vpop.f32.mrf.mxu1 }
 0x11a   : > { %5878 = vst [vmem:[#allocation25_spill] sm:$0xff] %v5085_v24 }
 0x11b   : > { %v5100_v38 = vpop.f32.mrf.mxu1 }
 0x11c   : > { %3837 = vmatmul.mubr.msk.bf16.gmra.mxu0 %vm711_vm3, %v4789_v9  ;;  %5879 = vst [vmem:[#allocation28_spill] sm:$0xff] %v5100_v38  ;;  %v3393_v9 = vcombine.low %v5093_v28, %v5096_v61 }
 0x11d   : > { %3840 = vmatprep.mubr.msk.bf16.mxu0 %vm711_vm3, %v3341_v3  ;;  %v5108_v27 = vpop.f32.mrf.mxu1 }
 0x11e   : > { %5880 = vst [vmem:[#allocation30_spill] sm:$0xff] %v5108_v27 }
 0x11f   : > { %3803 = vmatmul.mubr.msk.bf16.gmra.mxu1 %vm711_vm3, %v4816_v58 }
 0x120   : > { %3806 = vmatprep.mubr.msk.bf16.mxu1 %vm711_vm3, %v4825_v2 }
 0x124   : > { %v5110_v25 = vpop.f32.mrf.mxu0  ;;  %3841 = vmatmul.mubr.msk.bf16.gmra.mxu0 %vm711_vm3, %v3393_v9 }
 0x125   : > { %3880 = vmatprep.mubr.msk.bf16.mxu0 %vm711_vm3, %v4648_v37 }
 0x126   : > { %v5115_v41 = vpop.f32.mrf.mxu0 }
 0x127   : > { %v5117_v3 = vpop.f32.mrf.mxu1  ;;  %3807 = vmatmul.mubr.msk.bf16.gmra.mxu1 %vm711_vm3, %v4904_v11 }
 0x128   : > { %5881 = vst [vmem:[#allocation15_spill] sm:$0xff] %v5117_v3  ;;  %v5121_v51 = vpop.f32.mrf.mxu0  ;;  %3846 = vmatprep.mubr.msk.bf16.mxu1 %vm711_vm3, %v5865_v34 }
 0x129   : > { %v5125_v62 = vpop.f32.mrf.mxu1 }
 0x12a   : > { %5882 = vst [vmem:[#allocation10_spill] sm:$0xff] %v5125_v62  ;;  %v5127_v27 = vpop.f32.mrf.mxu0 }
 0x12b   : > { %v5129_v9 = vpop.f32.mrf.mxu1 }
 0x12c   : > { %5883 = vst [vmem:[#allocation11_spill] sm:$0xff] %v5129_v9  ;;  %v3678_v38 = vpop.f32.mrf.mxu0  ;;  %3881 = vmatmul.mubr.msk.bf16.vlgmr.msra.gmra.mxu0 %vm711_vm3, %v4688_v14 }
 0x12d   : > { %v5133_v37 = vpop.f32.mrf.mxu1  ;;  %3884 = vmatprep.mubr.msk.bf16.mxu0 %vm711_vm3, %v4690_v10 }
 0x12e   : > { %5884 = vst [vmem:[#allocation13_spill] sm:$0xff] %v5133_v37  ;;  %v1481_v3 = vpop.f32.mrf.mxu0 }
 0x12f   : > { %v3644_v24 = vpop.f32.mrf.mxu1  ;;  %3847 = vmatmul.mubr.msk.bf16.vlgmr.msra.gmra.mxu1 %vm711_vm3, %v5866_v42 }
 0x130   : > { %v1099_v34 = vadd.f32 %v3644_v24, %v5009_v63  ;;  %v3679_v62 = vpop.f32.mrf.mxu0  ;;  %3850 = vmatprep.mubr.msk.bf16.mxu1 %vm711_vm3, %v5867_v46 }
 0x131   : > { %v1090_v9 = vpop.f32.mrf.mxu1 }
 0x132   : > { %v5142_v54 = vadd.f32 %v3678_v38, %v1099_v34  ;;  %v1091_v14 = vadd.f32 %v1090_v9, %v5019_v53  ;;  %v1484_v37 = vpop.f32.mrf.mxu0 }
 0x133   : > { %v3645_v6 = vpop.f32.mrf.mxu1 }
 0x134   : > { %v5145_v32 = vadd.f32 %v1481_v3, %v1091_v14  ;;  %v1102_v10 = vadd.f32 %v3645_v6, %v5025_v56  ;;  %v3682_v12 = vpop.f32.mrf.mxu0  ;;  %3885 = vmatmul.mubr.msk.bf16.gmra.mxu0 %vm711_vm3, %v4725_v30 }
 0x135   : > { %v1093_v42 = vpop.f32.mrf.mxu1  ;;  %3888 = vmatprep.mubr.msk.bf16.mxu0 %vm711_vm3, %v4727_v1 }
 0x136   : > { %v5152_v46 = vadd.f32 %v3679_v62, %v1102_v10  ;;  %v1094_v63 = vadd.f32 %v1093_v42, %v5035_v59  ;;  %v1497_v24 = vpop.f32.mrf.mxu0 }
 0x137   : > { %v3648_v53 = vpop.f32.mrf.mxu1  ;;  %3851 = vmatmul.mubr.msk.bf16.gmra.mxu1 %vm711_vm3, %v5868_v19 }
 0x138   : > { %v5157_v38 = vadd.f32 %v1484_v37, %v1094_v63  ;;  %v1115_v56 = vadd.f32 %v3648_v53, %v5041_v20  ;;  %v3683_v6 = vpop.f32.mrf.mxu0  ;;  %3854 = vmatprep.mubr.msk.bf16.mxu1 %vm711_vm3, %v5869_v36 }
 0x139   : > { %v1106_v30 = vpop.f32.mrf.mxu1 }
 0x13a   : > { %v5162_v3 = vadd.f32 %v3682_v12, %v1115_v56  ;;  %v1107_v1 = vadd.f32 %v1106_v30, %v5051_v55  ;;  %v1500_v62 = vpop.f32.mrf.mxu0 }
 0x13b   : > { %v3649_v59 = vpop.f32.mrf.mxu1 }
 0x13c   : > { %v5165_v9 = vadd.f32 %v1497_v24, %v1107_v1  ;;  %v1118_v34 = vadd.f32 %v3649_v59, %v5057_v39  ;;  %v3686_v19 = vpop.f32.mrf.mxu0  ;;  %3889 = vmatmul.mubr.msk.bf16.gmra.mxu0 %vm711_vm3, %v4813_v23 }
 0x13d   : > { %v1109_v20 = vpop.f32.mrf.mxu1  ;;  %3892 = vmatprep.mubr.msk.bf16.mxu0 %vm711_vm3, %v4818_v8 }
 0x13e   : > { %v5172_v36 = vadd.f32 %v3683_v6, %v1118_v34  ;;  %v1110_v12 = vadd.f32 %v1109_v20, %v5067_v44  ;;  %v1513_v37 = vpop.f32.mrf.mxu0 }
 0x13f   : > { %v3652_v55 = vpop.f32.mrf.mxu1  ;;  %3855 = vmatmul.mubr.msk.bf16.gmra.mxu1 %vm711_vm3, %v4600_v15 }
 0x140   : > { %v5177_v14 = vadd.f32 %v1500_v62, %v1110_v12  ;;  %v1131_v39 = vadd.f32 %v3652_v55, %v5073_v18  ;;  %v3687_v10 = vpop.f32.mrf.mxu0  ;;  %3858 = vmatprep.mubr.msk.bf16.mxu1 %vm711_vm3, %v5870_v26 }
 0x141   : > { %v1122_v23 = vpop.f32.mrf.mxu1 }
 0x142   : > { %v5182_v42 = vadd.f32 %v3686_v19, %v1131_v39  ;;  %v1123_v8 = vadd.f32 %v1122_v23, %v5083_v29  ;;  %v1516_v63 = vpop.f32.mrf.mxu0 }
 0x143   : > { %v3653_v44 = vpop.f32.mrf.mxu1 }
 0x144   : > { %v5185_v24 = vadd.f32 %v1513_v37, %v1123_v8  ;;  %v1134_v53 = vadd.f32 %v3653_v44, %v5089_v43  ;;  %v3690_v15 = vpop.f32.mrf.mxu0  ;;  %3893 = vmatmul.mubr.msk.bf16.gmra.mxu0 %vm711_vm3, %v4851_v13  ;;  %v2488_v37 = vshll.u32 %v5093_v28, 16 }
 0x145   : > { %v1125_v18 = vpop.f32.mrf.mxu1  ;;  %3896 = vmatprep.mubr.msk.bf16.mxu0 %vm711_vm3, %v4853_v16 }
 0x146   : > { %v5192_v26 = vadd.f32 %v3687_v10, %v1134_v53  ;;  %v1126_v56 = vadd.f32 %v1125_v18, %v5102_v31  ;;  %v1529_v6 = vpop.f32.mrf.mxu0  ;;  %v2490_v44 = vrot.slane %v2488_v37, 5 }
 0x147   : > { %v3656_v29 = vpop.f32.mrf.mxu1  ;;  %3859 = vmatmul.mubr.msk.bf16.gmra.mxu1 %vm711_vm3, %v5871_v0 }
 0x148   : > { %v5197_v30 = vadd.f32 %v1516_v63, %v1126_v56  ;;  %v1147_v43 = vadd.f32 %v3656_v29, %v5110_v25  ;;  %v3691_v1 = vpop.f32.mrf.mxu0  ;;  %3862 = vmatprep.mubr.msk.bf16.mxu1 %vm711_vm3, %v5872_v35 }
 0x149   : > { %v1138_v13 = vpop.f32.mrf.mxu1 }
 0x14a   : > { %v5202_v62 = vadd.f32 %v3690_v15, %v1147_v43  ;;  %v1139_v16 = vadd.f32 %v1138_v13, %v5115_v41  ;;  %v1532_v59 = vpop.f32.mrf.mxu0  ;;  %v2485_v41 = vshrl.u32 %v5093_v28, 16 }
 0x14b   : > { %v3657_v31 = vpop.f32.mrf.mxu1 }
 0x14c   : > { %v5205_v34 = vadd.f32 %v1529_v6, %v1139_v16  ;;  %v1150_v19 = vadd.f32 %v3657_v31, %v5121_v51  ;;  %v3694_v0 = vpop.f32.mrf.mxu0  ;;  %3897 = vmatmul.mubr.msk.bf16.gmra.mxu0 %vm711_vm3, %v4768_v21  ;;  %v2494_v51 = vshll.u32 %v5096_v61, 16  ;;  %v2498_v21 = vshrl.u32 %v5096_v61, 16 }
 0x14d   : > { %v1141_v25 = vpop.f32.mrf.mxu1  ;;  %3900 = vmatprep.mubr.msk.bf16.mxu0 %vm711_vm3, %v4783_v50 }
 0x14e   : > { %v5212_v35 = vadd.f32 %v3691_v1, %v1150_v19  ;;  %v1142_v20 = vadd.f32 %v1141_v25, %v5127_v27  ;;  %v1545_v12 = vpop.f32.mrf.mxu0  ;;  %v2496_v15 = vrot.slane %v2494_v51, 5  ;;  %v2500_v18 = vrot.slane %v2498_v21, 4 }
 0x14f   : > { %v3660_v55 = vpop.f32.mrf.mxu1  ;;  %3863 = vmatmul.mubr.msk.bf16.gmra.mxu1 %vm711_vm3, %v5873_v40  ;;  %v2487_v40 = vrot.slane %v2485_v41, 4  ;;  %v3427_v19 = vrot.slane %v5093_v28, 9 }
 0x150   : > { %v5221_v39 = vadd.f32 %v1532_v59, %v1142_v20  ;;  %v1163_v50 = vadd.f32 %v3660_v55, %v5015_v47  ;;  %v3695_v10 = vpop.f32.mrf.mxu0  ;;  %3866 = vmatprep.mubr.msk.bf16.mxu1 %vm711_vm3, %v5874_v57  ;;  %v2713_v57 = vrot.slane %v5096_v61, 5 }
 0x151   : > { %v1154_v27 = vpop.f32.mrf.mxu1 }
 0x152   : > { %v5226_v23 = vadd.f32 %v3694_v0, %v1163_v50  ;;  %v1155_v8 = vadd.f32 %v1154_v27, %v5021_v33  ;;  %v1548_v63 = vpop.f32.mrf.mxu0  ;;  %v266_v33 = vld [vmem:[%s4211_s11 + $0xd4] sm:$0x1]  ;;  %s3452_s11 = sshll.u32 %s4163_s19, 12 }
 0x153   : > { %v3661_v53 = vpop.f32.mrf.mxu1  ;;  %v2504_v31 = vshll.u32 %v266_v33, 16  ;;  %v2716_v25 = vrot.slane %v266_v33, 5  ;;  %s5657_s22 = scalar_lea.hbm %s5773_s2, %s3452_s11 }
 0x154   : > { %v5229_v56 = vadd.f32 %v1545_v12, %v1155_v8  ;;  %v1166_v47 = vadd.f32 %v3661_v53, %v5031_v17  ;;  %v3698_v6 = vpop.f32.mrf.mxu0  ;;  %3901 = vmatmul.mubr.msk.bf16.gmra.mxu0 %vm711_vm3, %v4805_v52  ;;  %v2491_v17 = vor.u32 %v2490_v44, %v2487_v40 }
 0x155   : > { %v1157_v29 = vpop.f32.mrf.mxu1  ;;  %3904 = vmatprep.mubr.msk.bf16.mxu0 %vm711_vm3, %v4816_v58  ;;  %v2501_v58 = vor.u32 %v2500_v18, %v2496_v15  ;;  %v2506_v28 = vrot.slane %v2504_v31, 5 }
 0x156   : > { %v5238_v43 = vadd.f32 %v3695_v10, %v1166_v47  ;;  %v1158_v1 = vadd.f32 %v1157_v29, %v5037_v4  ;;  %v1561_v13 = vpop.f32.mrf.mxu0  ;;  %v2715_v4 = vrot.slane %v2713_v57, 4  ;;  %v2492_v37 = vrot.slane %v2491_v17, 4  ;;  %v5888_v47 = vld [vmem:[#allocation23_spill] sm:$0xff]  ;;  %v5889_v29 = vld [vmem:[#allocation25_spill] sm:$0xff]  ;;  %v5890_v17 = vld [vmem:[#allocation28_spill] sm:$0xff] }
 0x157   : > { %v3664_v16 = vpop.f32.mrf.mxu1  ;;  %3867 = vmatmul.mubr.msk.bf16.gmra.mxu1 %vm711_vm3, %v5875_v7 }
 0x158   : > { %v5243_v59 = vadd.f32 %v1548_v63, %v1158_v1  ;;  %v1179_v52 = vadd.f32 %v3664_v16, %v5047_v48  ;;  %v3699_v61 = vpop.f32.mrf.mxu0  ;;  %3870 = vmatprep.mubr.msk.bf16.mxu1 %vm711_vm3, %v4574_v5  ;;  %v2502_v5 = vrot.slane %v2501_v58, 4  ;;  %v2717_v50 = vsel %vm4579_vm7, %v2715_v4, %v2716_v25  ;;  %v5885_v63 = vld [vmem:[#allocation32_spill] sm:$0xff] }
 0x159   : > { %v1170_v0 = vpop.f32.mrf.mxu1  ;;  %v2497_v40 = vsel %vm4256_vm4, %v2492_v37, %v2496_v15 }
 0x15a   : > { %v5249_v20 = vadd.f32 %v3698_v6, %v1179_v52  ;;  %v1171_v7 = vadd.f32 %v1170_v0, %v5053_v45  ;;  %v1564_v12 = vpop.f32.mrf.mxu0  ;;  %v2714_v45 = vsel %vm4579_vm7, %v3427_v19, %v2713_v57  ;;  %v2507_v60 = vsel %vm4256_vm4, %v2502_v5, %v2506_v28  ;;  %v5891_v19 = vld [vmem:[#allocation30_spill] sm:$0xff] }
 0x15b   : > { %v3665_v41 = vpop.f32.mrf.mxu1  ;;  %v3410_v15 = vcombine.low %v2497_v40, %v2507_v60  ;;  %v5893_v5 = vld [vmem:[#allocation10_spill] sm:$0xff]  ;;  %v5895_v40 = vld [vmem:[#allocation13_spill] sm:$0xff] }
 0x15c   : > { %v5252_v55 = vadd.f32 %v1561_v13, %v1171_v7  ;;  %v1182_v48 = vadd.f32 %v3665_v41, %v5063_v22  ;;  %v3702_v51 = vpop.f32.mrf.mxu0  ;;  %3905 = vmatmul.mubr.msk.bf16.gmra.mxu0 %vm711_vm3, %v4825_v2 }
 0x15d   : > { %v1173_v21 = vpop.f32.mrf.mxu1  ;;  %3908 = vmatprep.mubr.msk.bf16.mxu0 %vm711_vm3, %v4904_v11  ;;  %v5887_v11 = vld [vmem:[#allocation27_spill] sm:$0xff] }
 0x15e   : > { %v5263_v10 = vadd.f32 %v3699_v61, %v1182_v48  ;;  %v1174_v22 = vadd.f32 %v1173_v21, %v5069_v49  ;;  %v1577_v27 = vpop.f32.mrf.mxu0  ;;  %v3428_v49 = vcombine.low %v2714_v45, %v2717_v50 }
 0x15f   : > { %v3668_v8 = vpop.f32.mrf.mxu1  ;;  %3871 = vmatmul.mubr.msk.bf16.gmra.mxu1 %vm711_vm3, %v5885_v63 }
 0x160   : > { %v5270_v44 = vadd.f32 %v1564_v12, %v1174_v22  ;;  %v1195_v53 = vadd.f32 %v3668_v8, %v5887_v11  ;;  %v3703_v18 = vpop.f32.mrf.mxu0  ;;  %3874 = vmatprep.mubr.msk.bf16.mxu1 %vm711_vm3, %v5888_v47  ;;  %v5892_v12 = vld [vmem:[#allocation15_spill] sm:$0xff] }
 0x161   : > { %v1186_v6 = vpop.f32.mrf.mxu1  ;;  %v5894_v22 = vld [vmem:[#allocation11_spill] sm:$0xff] }
 0x162   : > { %v5277_v57 = vadd.f32 %v3702_v51, %v1195_v53  ;;  %v1187_v33 = vadd.f32 %v1186_v6, %v5889_v29  ;;  %v1580_v1 = vpop.f32.mrf.mxu0 }
 0x163   : > { %v3669_v13 = vpop.f32.mrf.mxu1 }
 0x164   : > { %v5280_v16 = vadd.f32 %v1577_v27, %v1187_v33  ;;  %v1198_v52 = vadd.f32 %v3669_v13, %v5890_v17  ;;  %v3706_v61 = vpop.f32.mrf.mxu0  ;;  %3909 = vmatmul.mubr.msk.bf16.gmra.mxu0 %vm711_vm3, %v3428_v49 }
 0x165   : > { %v1189_v58 = vpop.f32.mrf.mxu1 }
 0x166   : > { %v5284_v31 = vadd.f32 %v3703_v18, %v1198_v52  ;;  %v1190_v0 = vadd.f32 %v1189_v58, %v5891_v19  ;;  %v1593_v4 = vpop.f32.mrf.mxu0 }
 0x167   : > { %v3672_v25 = vpop.f32.mrf.mxu1  ;;  %3875 = vmatmul.mubr.msk.bf16.gmra.mxu1 %vm711_vm3, %v3410_v15 }
 0x168   : > { %v5288_v7 = vadd.f32 %v1580_v1, %v1190_v0  ;;  %v1211_v41 = vadd.f32 %v3672_v25, %v5892_v12  ;;  %v3707_v37 = vpop.f32.mrf.mxu0 }
 0x169   : > { %v1202_v48 = vpop.f32.mrf.mxu1 }
 0x16a   : > { %v5291_v51 = vadd.f32 %v3706_v61, %v1211_v41  ;;  %v1203_v28 = vadd.f32 %v1202_v48, %v5893_v5  ;;  %v1596_v21 = vpop.f32.mrf.mxu0 }
 0x16b   : > { %v3673_v45 = vpop.f32.mrf.mxu1 }
 0x16c   : > { %v5294_v50 = vadd.f32 %v1593_v4, %v1203_v28  ;;  %v1214_v27 = vadd.f32 %v3673_v45, %v5894_v22  ;;  %v3746_v8 = vpop.f32.mrf.mxu0 }
 0x16d   : > { %v1205_v63 = vpop.f32.mrf.mxu1 }
 0x16e   : > { %v5297_v2 = vadd.f32 %v3707_v37, %v1214_v27  ;;  %v1206_v11 = vadd.f32 %v1205_v63, %v5895_v40  ;;  %v1911_v53 = vpop.f32.mrf.mxu0 }
 0x16f   : > { %v3712_v18 = vpop.f32.mrf.mxu1 }
 0x170   : > { %v5300_v47 = vadd.f32 %v1596_v21, %v1206_v11  ;;  %v1814_v60 = vadd.f32 %v3712_v18, %v5142_v54  ;;  %v3747_v49 = vpop.f32.mrf.mxu0 }
 0x171   : > { %v1685_v6 = vpop.f32.mrf.mxu1 }
 0x172   : > { %v5303_v29 = vadd.f32 %v3746_v8, %v1814_v60  ;;  %v1812_v33 = vadd.f32 %v1685_v6, %v5145_v32  ;;  %v1914_v1 = vpop.f32.mrf.mxu0 }
 0x173   : > { %v3713_v13 = vpop.f32.mrf.mxu1 }
 0x174   : > { %v5306_v15 = vadd.f32 %v1911_v53, %v1812_v33  ;;  %v1815_v17 = vadd.f32 %v3713_v13, %v5152_v46  ;;  %v3750_v52 = vpop.f32.mrf.mxu0 }
 0x175   : > { %v1688_v61 = vpop.f32.mrf.mxu1 }
 0x176   : > { %v5309_v58 = vadd.f32 %v3747_v49, %v1815_v17  ;;  %v1813_v19 = vadd.f32 %v1688_v61, %v5157_v38  ;;  %v1927_v0 = vpop.f32.mrf.mxu0 }
 0x177   : > { %v3716_v54 = vpop.f32.mrf.mxu1 }
 0x178   : > { %v5312_v4 = vadd.f32 %v1914_v1, %v1813_v19  ;;  %v1818_v25 = vadd.f32 %v3716_v54, %v5162_v3  ;;  %v3751_v12 = vpop.f32.mrf.mxu0 }
 0x179   : > { %v1701_v32 = vpop.f32.mrf.mxu1 }
 0x17a   : > { %v5315_v41 = vadd.f32 %v3750_v52, %v1818_v25  ;;  %v1816_v37 = vadd.f32 %v1701_v32, %v5165_v9  ;;  %v1930_v48 = vpop.f32.mrf.mxu0 }
 0x17b   : > { %v3717_v46 = vpop.f32.mrf.mxu1 }
 0x17c   : > { %v5318_v5 = vadd.f32 %v1927_v0, %v1816_v37  ;;  %v1819_v28 = vadd.f32 %v3717_v46, %v5172_v36  ;;  %v3754_v21 = vpop.f32.mrf.mxu0 }
 0x17d   : > { %v1704_v38 = vpop.f32.mrf.mxu1 }
 0x17e   : > { %v5321_v45 = vadd.f32 %v3751_v12, %v1819_v28  ;;  %v1817_v22 = vadd.f32 %v1704_v38, %v5177_v14  ;;  %v1943_v27 = vpop.f32.mrf.mxu0 }
 0x17f   : > { %v3720_v3 = vpop.f32.mrf.mxu1 }
 0x180   : > { %v5324_v8 = vadd.f32 %v1930_v48, %v1817_v22  ;;  %v1822_v63 = vadd.f32 %v3720_v3, %v5182_v42  ;;  %v3755_v40 = vpop.f32.mrf.mxu0 }
 0x181   : > { %v1717_v9 = vpop.f32.mrf.mxu1 }
 0x182   : > { %v5327_v11 = vadd.f32 %v3754_v21, %v1822_v63  ;;  %v1820_v53 = vadd.f32 %v1717_v9, %v5185_v24  ;;  %v1946_v18 = vpop.f32.mrf.mxu0 }
 0x183   : > { %v3721_v36 = vpop.f32.mrf.mxu1 }
 0x184   : > { %v5330_v60 = vadd.f32 %v1943_v27, %v1820_v53  ;;  %v1823_v49 = vadd.f32 %v3721_v36, %v5192_v26  ;;  %v3758_v6 = vpop.f32.mrf.mxu0 }
 0x185   : > { %v1720_v14 = vpop.f32.mrf.mxu1 }
 0x186   : > { %v5333_v33 = vadd.f32 %v3755_v40, %v1823_v49  ;;  %v1821_v1 = vadd.f32 %v1720_v14, %v5197_v30  ;;  %v1959_v13 = vpop.f32.mrf.mxu0 }
 0x187   : > { %v3724_v42 = vpop.f32.mrf.mxu1 }
 0x188   : > { %v5336_v17 = vadd.f32 %v1946_v18, %v1821_v1  ;;  %v1826_v52 = vadd.f32 %v3724_v42, %v5202_v62  ;;  %v3759_v61 = vpop.f32.mrf.mxu0 }
 0x189   : > { %v1733_v24 = vpop.f32.mrf.mxu1 }
 0x18a   : > { %v5339_v19 = vadd.f32 %v3758_v6, %v1826_v52  ;;  %v1824_v0 = vadd.f32 %v1733_v24, %v5205_v34  ;;  %v1962_v54 = vpop.f32.mrf.mxu0 }
 0x18b   : > { %v3725_v26 = vpop.f32.mrf.mxu1 }
 0x18c   : > { %v5342_v25 = vadd.f32 %v1959_v13, %v1824_v0  ;;  %v1827_v12 = vadd.f32 %v3725_v26, %v5212_v35  ;;  %v3762_v32 = vpop.f32.mrf.mxu0 }
 0x18d   : > { %v1736_v30 = vpop.f32.mrf.mxu1 }
 0x18e   : > { %v5345_v37 = vadd.f32 %v3759_v61, %v1827_v12  ;;  %v1825_v48 = vadd.f32 %v1736_v30, %v5221_v39  ;;  %v1975_v46 = vpop.f32.mrf.mxu0 }
 0x18f   : > { %v3728_v62 = vpop.f32.mrf.mxu1 }
 0x190   : > { %v5348_v28 = vadd.f32 %v1962_v54, %v1825_v48  ;;  %v1830_v21 = vadd.f32 %v3728_v62, %v5226_v23  ;;  %v3763_v38 = vpop.f32.mrf.mxu0 }
 0x191   : > { %v1749_v34 = vpop.f32.mrf.mxu1 }
 0x192   : > { %v5351_v22 = vadd.f32 %v3762_v32, %v1830_v21  ;;  %v1828_v27 = vadd.f32 %v1749_v34, %v5229_v56  ;;  %v1978_v3 = vpop.f32.mrf.mxu0 }
 0x193   : > { %v3729_v35 = vpop.f32.mrf.mxu1 }
 0x194   : > { %v5354_v63 = vadd.f32 %v1975_v46, %v1828_v27  ;;  %v1831_v40 = vadd.f32 %v3729_v35, %v5238_v43  ;;  %v3766_v9 = vpop.f32.mrf.mxu0 }
 0x195   : > { %v1752_v39 = vpop.f32.mrf.mxu1 }
 0x196   : > { %v5357_v53 = vadd.f32 %v3763_v38, %v1831_v40  ;;  %v1829_v18 = vadd.f32 %v1752_v39, %v5243_v59  ;;  %v1991_v36 = vpop.f32.mrf.mxu0 }
 0x197   : > { %v3732_v23 = vpop.f32.mrf.mxu1 }
 0x198   : > { %5896 = vst [vmem:[#allocation16_spill] sm:$0xff] %v5357_v53  ;;  %v5360_v49 = vadd.f32 %v1978_v3, %v1829_v18  ;;  %v1834_v6 = vadd.f32 %v3732_v23, %v5249_v20  ;;  %v3767_v14 = vpop.f32.mrf.mxu0 }
 0x199   : > { %v1765_v56 = vpop.f32.mrf.mxu1 }
 0x19a   : > { %5897 = vst [vmem:[#allocation14_spill] sm:$0xff] %v5360_v49  ;;  %v5363_v1 = vadd.f32 %v3766_v9, %v1834_v6  ;;  %v1832_v13 = vadd.f32 %v1765_v56, %v5252_v55  ;;  %v1994_v42 = vpop.f32.mrf.mxu0 }
 0x19b   : > { %v3733_v43 = vpop.f32.mrf.mxu1 }
 0x19c   : > { %5898 = vst [vmem:[#allocation18_spill] sm:$0xff] %v5363_v1  ;;  %v5366_v52 = vadd.f32 %v1991_v36, %v1832_v13  ;;  %v1835_v61 = vadd.f32 %v3733_v43, %v5263_v10  ;;  %v3770_v24 = vpop.f32.mrf.mxu0 }
 0x19d   : > { %v1768_v59 = vpop.f32.mrf.mxu1 }
 0x19e   : > { %5899 = vst [vmem:[#allocation20_spill] sm:$0xff] %v5366_v52  ;;  %v5369_v0 = vadd.f32 %v3767_v14, %v1835_v61  ;;  %v1833_v54 = vadd.f32 %v1768_v59, %v5270_v44  ;;  %v2007_v26 = vpop.f32.mrf.mxu0 }
 0x19f   : > { %v3736_v20 = vpop.f32.mrf.mxu1 }
 0x1a0   : > { %5900 = vst [vmem:[#allocation22_spill] sm:$0xff] %v5369_v0  ;;  %v5372_v12 = vadd.f32 %v1994_v42, %v1833_v54  ;;  %v1838_v32 = vadd.f32 %v3736_v20, %v5277_v57  ;;  %v3771_v30 = vpop.f32.mrf.mxu0 }
 0x1a1   : > { %v1781_v55 = vpop.f32.mrf.mxu1 }
 0x1a2   : > { %5901 = vst [vmem:[#allocation26_spill] sm:$0xff] %v5372_v12  ;;  %v5375_v48 = vadd.f32 %v3770_v24, %v1838_v32  ;;  %v1836_v46 = vadd.f32 %v1781_v55, %v5280_v16  ;;  %v2010_v62 = vpop.f32.mrf.mxu0 }
 0x1a3   : > { %v3737_v10 = vpop.f32.mrf.mxu1 }
 0x1a4   : > { %5902 = vst [vmem:[#allocation31_spill] sm:$0xff] %v5375_v48  ;;  %v5378_v21 = vadd.f32 %v2007_v26, %v1836_v46  ;;  %v1839_v38 = vadd.f32 %v3737_v10, %v5284_v31  ;;  %v3774_v34 = vpop.f32.mrf.mxu0 }
 0x1a5   : > { %v1784_v44 = vpop.f32.mrf.mxu1 }
 0x1a6   : > { %5903 = vst [vmem:[#allocation12_spill] sm:$0xff] %v5378_v21  ;;  %v5381_v27 = vadd.f32 %v3771_v30, %v1839_v38  ;;  %v1837_v3 = vadd.f32 %v1784_v44, %v5288_v7  ;;  %v2023_v35 = vpop.f32.mrf.mxu0 }
 0x1a7   : > { %v3740_v57 = vpop.f32.mrf.mxu1 }
 0x1a8   : > { %5904 = vst [vmem:[#allocation17_spill] sm:$0xff] %v5381_v27  ;;  %v5384_v40 = vadd.f32 %v2010_v62, %v1837_v3  ;;  %v1842_v9 = vadd.f32 %v3740_v57, %v5291_v51  ;;  %v3775_v39 = vpop.f32.mrf.mxu0 }
 0x1a9   : > { %v1797_v16 = vpop.f32.mrf.mxu1 }
 0x1aa   : > { %5905 = vst [vmem:[#allocation19_spill] sm:$0xff] %v5384_v40  ;;  %v5387_v18 = vadd.f32 %v3774_v34, %v1842_v9  ;;  %v1840_v36 = vadd.f32 %v1797_v16, %v5294_v50  ;;  %v2026_v23 = vpop.f32.mrf.mxu0 }
 0x1ab   : > { %v3741_v31 = vpop.f32.mrf.mxu1 }
 0x1ac   : > { %5906 = vst [vmem:[#allocation21_spill] sm:$0xff] %v5387_v18  ;;  %v5390_v6 = vadd.f32 %v2023_v35, %v1840_v36  ;;  %v1843_v14 = vadd.f32 %v3741_v31, %v5297_v2  ;;  %v5393_v56 = vpop.f32.mrf.mxu0 }
 0x1ad   : > { %v1800_v7 = vpop.f32.mrf.mxu1 }
 0x1ae   : > { %5907 = vst [vmem:[#allocation24_spill] sm:$0xff] %v5390_v6  ;;  %v5395_v13 = vadd.f32 %v3775_v39, %v1843_v14  ;;  %v1841_v42 = vadd.f32 %v1800_v7, %v5300_v47  ;;  %v5398_v51 = vpop.f32.mrf.mxu0 }
 0x1af   : > { %v3780_v43 = vpop.f32.mrf.mxu1 }
 0x1b0   : > { %5908 = vst [vmem:[#allocation29_spill] sm:$0xff] %v5395_v13  ;;  %v5400_v61 = vadd.f32 %v2026_v23, %v1841_v42  ;;  %v5402_v24 = vpop.f32.mrf.mxu0 }
 0x1b1   : > { %v2121_v50 = vpop.f32.mrf.mxu1 }
 0x1b2   : > { %5909 = vst [vmem:[#allocation32_spill] sm:$0xff] %v5400_v61  ;;  %v5404_v59 = vpop.f32.mrf.mxu0 }
 0x1b3   : > { %v5406_v54 = vpop.f32.mrf.mxu1 }
 0x1b4   : > { %v5408_v2 = vpop.f32.mrf.mxu0 }
 0x1b5   : > { %v5410_v26 = vpop.f32.mrf.mxu1 }
 0x1b6   : > { %v5412_v20 = vpop.f32.mrf.mxu0 }
 0x1b7   : > { %v5414_v32 = vpop.f32.mrf.mxu1 }
 0x1b8   : > { %v5416_v47 = vpop.f32.mrf.mxu0 }
 0x1b9   : > { %v5418_v30 = vpop.f32.mrf.mxu1 }
 0x1ba   : > { %v5420_v55 = vpop.f32.mrf.mxu0 }
 0x1bb   : > { %v5422_v46 = vpop.f32.mrf.mxu1 }
 0x1bc   : > { %v5424_v62 = vpop.f32.mrf.mxu0 }
 0x1bd   : > { %v5426_v10 = vpop.f32.mrf.mxu1 }
 0x1be   : > { %v5428_v38 = vpop.f32.mrf.mxu0 }
 0x1bf   : > { %v5430_v34 = vpop.f32.mrf.mxu1 }
 0x1c0   : > { %v5432_v44 = vpop.f32.mrf.mxu0 }
 0x1c1   : > { %v5434_v3 = vpop.f32.mrf.mxu1 }
 0x1c2   : > { %v5436_v35 = vpop.f32.mrf.mxu0 }
 0x1c3   : > { %v5438_v57 = vpop.f32.mrf.mxu1 }
 0x1c4   : > { %v5440_v9 = vpop.f32.mrf.mxu0 }
 0x1c5   : > { %v5442_v39 = vpop.f32.mrf.mxu1 }
 0x1c6   : > { %v5444_v16 = vpop.f32.mrf.mxu0 }
 0x1c7   : > { %v5446_v36 = vpop.f32.mrf.mxu1 }
 0x1c8   : > { %v5448_v23 = vpop.f32.mrf.mxu0 }
 0x1c9   : > { %v5450_v31 = vpop.f32.mrf.mxu1 }
 0x1ca   : > { %v5452_v14 = vpop.f32.mrf.mxu0 }
 0x1cb   : > { %v5454_v7 = vpop.f32.mrf.mxu1 }
 0x1cc   : > { %v5456_v42 = vpop.f32.mrf.mxu0 }
 0x1cd   : > { %v5458_v61 = vpop.f32.mrf.mxu1 }
 0x1ce   : > { %v5460_v13 = vpop.f32.mrf.mxu0 }
 0x1cf   : > { %5910 = vst [vmem:[#allocation9_spill] sm:$0xff] %v5460_v13  ;;  %v5462_v6 = vpop.f32.mrf.mxu1 }
 0x1d0   : > { %v5464_v18 = vpop.f32.mrf.mxu0 }
 0x1d1   : > { %5911 = vst [vmem:[#allocation27_spill] sm:$0xff] %v5464_v18  ;;  %v5466_v40 = vpop.f32.mrf.mxu1 }
 0x1d2   : > { %v5468_v27 = vpop.f32.mrf.mxu0 }
 0x1d3   : > { %5912 = vst [vmem:[#allocation23_spill] sm:$0xff] %v5468_v27  ;;  %v5470_v21 = vpop.f32.mrf.mxu1 }
 0x1d4   : > { %5913 = vst [vmem:[#allocation25_spill] sm:$0xff] %v5470_v21  ;;  %v5472_v48 = vpop.f32.mrf.mxu0 }
 0x1d5   : > { %5914 = vst [vmem:[#allocation28_spill] sm:$0xff] %v5472_v48  ;;  %v5474_v12 = vpop.f32.mrf.mxu1 }
 0x1d6   : > { %5915 = vst [vmem:[#allocation30_spill] sm:$0xff] %v5474_v12  ;;  %v5476_v0 = vpop.f32.mrf.mxu0 }
 0x1d7   : > { %5916 = vst [vmem:[#allocation15_spill] sm:$0xff] %v5476_v0  ;;  %v5478_v52 = vpop.f32.mrf.mxu1 }
 0x1d8   : > { %5917 = vst [vmem:[#allocation10_spill] sm:$0xff] %v5478_v52  ;;  %v5480_v1 = vpop.f32.mrf.mxu0 }
 0x1d9   : > { %5918 = vst [vmem:[#allocation11_spill] sm:$0xff] %v5480_v1  ;;  %v5482_v49 = vpop.f32.mrf.mxu1 }
 0x1da   : > { %5919 = vst [vmem:[#allocation13_spill] sm:$0xff] %v5482_v49  ;;  %v5484_v13 = vpop.f32.mrf.mxu0 }
 0x1db   : > { %5920 = vst [vmem:[#allocation33_spill] sm:$0xff] %v5484_v13  ;;  %v5486_v18 = vpop.f32.mrf.mxu1 }
 0x1dc   : > { %5921 = vst [vmem:[#allocation34_spill] sm:$0xff] %v5486_v18  ;;  %v5488_v53 = vpop.f32.mrf.mxu0 }
 0x1dd   : > { %5922 = vst [vmem:[#allocation35_spill] sm:$0xff] %v5488_v53  ;;  %v5490_v27 = vpop.f32.mrf.mxu1 }
 0x1de   : > { %5923 = vst [vmem:[#allocation36_spill] sm:$0xff] %v5490_v27  ;;  %v5492_v48 = vpop.f32.mrf.mxu0 }
 0x1df   : > { %5924 = vst [vmem:[#allocation37_spill] sm:$0xff] %v5492_v48  ;;  %v5494_v12 = vpop.f32.mrf.mxu1 }
 0x1e0   : > { %5925 = vst [vmem:[#allocation38_spill] sm:$0xff] %v5494_v12  ;;  %v5496_v0 = vpop.f32.mrf.mxu0 }
 0x1e1   : > { %5926 = vst [vmem:[#allocation39_spill] sm:$0xff] %v5496_v0  ;;  %v5498_v52 = vpop.f32.mrf.mxu1  ;;  %v2250_v0 = vadd.f32 %v3780_v43, %v5303_v29 }
 0x1e2   : > { %5927 = vst [vmem:[#allocation40_spill] sm:$0xff] %v5498_v52  ;;  %v5500_v1 = vpop.f32.mrf.mxu0 }
 0x1e3   : > { %5928 = vst [vmem:[#allocation41_spill] sm:$0xff] %v5500_v1  ;;  %v5502_v49 = vpop.f32.mrf.mxu1 }
 0x1e4   : > { %5929 = vst [vmem:[#allocation42_spill] sm:$0xff] %v5502_v49  ;;  %v5504_v13 = vpop.f32.mrf.mxu0 }
 0x1e5   : > { %5930 = vst [vmem:[#allocation43_spill] sm:$0xff] %v5504_v13  ;;  %v5506_v18 = vpop.f32.mrf.mxu1  ;;  %v2248_v13 = vadd.f32 %v2121_v50, %v5306_v15  ;;  %v2254_v50 = vadd.f32 %v5414_v32, %v5315_v41 }
 0x1e6   : > { %5931 = vst [vmem:[#allocation44_spill] sm:$0xff] %v5506_v18  ;;  %v5508_v53 = vpop.f32.mrf.mxu0 }
 0x1e7   : > { %5932 = vst [vmem:[#allocation45_spill] sm:$0xff] %v5508_v53  ;;  %v5510_v27 = vpop.f32.mrf.mxu1  ;;  %v2454_v53 = vadd.f32 %v5393_v56, %v2250_v0  ;;  %v2452_v43 = vadd.f32 %v5398_v51, %v2248_v13  ;;  %v2252_v13 = vadd.f32 %v5418_v30, %v5318_v5  ;;  %v2458_v41 = vadd.f32 %v5408_v2, %v2254_v50 }
 0x1e8   : > { %5933 = vst [vmem:[#allocation46_spill] sm:$0xff] %v5510_v27  ;;  %v5512_v21 = vpop.f32.mrf.mxu0  ;;  %v2255_v5 = vadd.f32 %v5422_v46, %v5321_v45  ;;  %v2258_v2 = vadd.f32 %v5430_v34, %v5327_v11 }
 0x1e9   : > { %5934 = vst [vmem:[#allocation47_spill] sm:$0xff] %v5512_v21  ;;  %v5514_v48 = vpop.f32.mrf.mxu1  ;;  %v2251_v21 = vadd.f32 %v5406_v54, %v5309_v58 }
 0x1ea   : > { %5935 = vst [vmem:[#allocation48_spill] sm:$0xff] %v5514_v48  ;;  %v5517_v12 = vpop.f32.mrf.mxu0  ;;  %v2462_v34 = vadd.f32 %v5424_v62, %v2258_v2  ;;  %v2262_v2 = vadd.f32 %v5446_v36, %v5339_v19 }
 0x1eb   : > { %5936 = vst [vmem:[#allocation49_spill] sm:$0xff] %v5517_v12  ;;  %v5519_v52 = vpop.f32.mrf.mxu1  ;;  %v2249_v12 = vadd.f32 %v5410_v26, %v5312_v4  ;;  %v2455_v15 = vadd.f32 %v5402_v24, %v2251_v21 }
 0x1ec   : > { %5937 = vst [vmem:[#allocation50_spill] sm:$0xff] %v5519_v52  ;;  %v3882_v1 = vpop.f32.mrf.mxu0 }
 0x1ed   : > { %v5525_v18 = vpop.f32.mrf.mxu1  ;;  %v2453_v54 = vadd.f32 %v5404_v59, %v2249_v12  ;;  %v2253_v12 = vadd.f32 %v5426_v10, %v5324_v8  ;;  %v2456_v59 = vadd.f32 %v5412_v20, %v2252_v13  ;;  %v2459_v8 = vadd.f32 %v5416_v47, %v2255_v5 }
 0x1ee   : > { %5938 = vst [vmem:[#allocation51_spill] sm:$0xff] %v5525_v18  ;;  %v2761_v48 = vpop.f32.mrf.mxu0  ;;  %v2259_v13 = vadd.f32 %v5438_v57, %v5333_v33 }
 0x1ef   : > { %v3848_v29 = vpop.f32.mrf.mxu1  ;;  %v2457_v20 = vadd.f32 %v5420_v55, %v2253_v12 }
 0x1f0   : > { %v2680_v52 = vadd.f32 %v3848_v29, %v2454_v53  ;;  %v3883_v27 = vpop.f32.mrf.mxu0 }
 0x1f1   : > { %v2551_v49 = vpop.f32.mrf.mxu1 }
 0x1f2   : > { %v2890_v0 = vadd.f32 %v3882_v1, %v2680_v52  ;;  %v2678_v56 = vadd.f32 %v2551_v49, %v2452_v43  ;;  %v2764_v18 = vpop.f32.mrf.mxu0 }
 0x1f3   : > { %v3849_v58 = vpop.f32.mrf.mxu1 }
 0x1f4   : > { %2922 = vst [vmem:[%s5540_s10 + $0x10] sm:$0xff] %v2890_v0  ;;  %v2888_v4 = vadd.f32 %v2761_v48, %v2678_v56  ;;  %v2681_v53 = vadd.f32 %v3849_v58, %v2455_v15  ;;  %v3886_v21 = vpop.f32.mrf.mxu0  ;;  %v2992_v10 = vmul.f32 %v2890_v0, %v2890_v0 }
 0x1f5   : > { %v2554_v51 = vpop.f32.mrf.mxu1 }
 0x1f6   : > { %2920 = vst [vmem:[%s5540_s10] sm:$0xff] %v2888_v4  ;;  %v2891_v49 = vadd.f32 %v3883_v27, %v2681_v53  ;;  %v2679_v1 = vadd.f32 %v2554_v51, %v2453_v54  ;;  %v2777_v52 = vpop.f32.mrf.mxu0  ;;  %v2990_v27 = vmul.f32 %v2888_v4, %v2888_v4  ;;  %v2256_v54 = vadd.f32 %v5434_v3, %v5330_v60 }
 0x1f7   : > { %v3852_v24 = vpop.f32.mrf.mxu1 }
 0x1f8   : > { %2923 = vst [vmem:[%s5540_s10 + $0x18] sm:$0xff] %v2891_v49  ;;  %v2889_v48 = vadd.f32 %v2764_v18, %v2679_v1  ;;  %v2684_v26 = vadd.f32 %v3852_v24, %v2458_v41  ;;  %v3887_v32 = vpop.f32.mrf.mxu0  ;;  %v2993_v53 = vmul.f32 %v2891_v49, %v2891_v49  ;;  %v2257_v41 = vadd.f32 %v5442_v39, %v5336_v17 }
 0x1f9   : > { %v2567_v30 = vpop.f32.mrf.mxu1  ;;  %v2460_v12 = vadd.f32 %v5428_v38, %v2256_v54  ;;  %v2463_v24 = vadd.f32 %v5432_v44, %v2259_v13  ;;  %v2261_v13 = vadd.f32 %v5458_v61, %v5348_v28 }
 0x1fa   : > { %2921 = vst [vmem:[%s5540_s10 + $0x8] sm:$0xff] %v2889_v48  ;;  %v2952_v29 = vadd.f32 %v2889_v48, %v2888_v4  ;;  %v2991_v43 = vmul.f32 %v2889_v48, %v2889_v48  ;;  %v2894_v45 = vadd.f32 %v3886_v21, %v2684_v26  ;;  %v2682_v46 = vadd.f32 %v2567_v30, %v2456_v59  ;;  %v2780_v15 = vpop.f32.mrf.mxu0 }
 0x1fb   : > { %v3853_v18 = vpop.f32.mrf.mxu1 }
 0x1fc   : > { %v2953_v50 = vadd.f32 %v2952_v29, %v2890_v0  ;;  %v3022_v56 = vadd.f32 %v2991_v43, %v2990_v27  ;;  %2926 = vst [vmem:[%s5540_s10 + $0x30] sm:$0xff] %v2894_v45  ;;  %v2892_v58 = vadd.f32 %v2777_v52, %v2682_v46  ;;  %v3890_v11 = vpop.f32.mrf.mxu0  ;;  %v2685_v4 = vadd.f32 %v3853_v18, %v2459_v8 }
 0x1fd   : > { %v2570_v47 = vpop.f32.mrf.mxu1  ;;  %v2260_v27 = vadd.f32 %v5450_v31, %v5342_v25  ;;  %v2996_v44 = vmul.f32 %v2894_v45, %v2894_v45  ;;  %v2263_v8 = vadd.f32 %v5454_v7, %v5345_v37 }
 0x1fe   : > { %v3023_v21 = vadd.f32 %v3022_v56, %v2992_v10  ;;  %2924 = vst [vmem:[%s5540_s10 + $0x20] sm:$0xff] %v2892_v58  ;;  %v2954_v55 = vadd.f32 %v2953_v50, %v2891_v49  ;;  %v2683_v0 = vadd.f32 %v2570_v47, %v2457_v20  ;;  %v2793_v51 = vpop.f32.mrf.mxu0  ;;  %v2994_v62 = vmul.f32 %v2892_v58, %v2892_v58 }
 0x1ff   : > { %v2895_v1 = vadd.f32 %v3887_v32, %v2685_v4  ;;  %v3856_v52 = vpop.f32.mrf.mxu1  ;;  %v2461_v32 = vadd.f32 %v5436_v35, %v2257_v41  ;;  %v2466_v50 = vadd.f32 %v5440_v9, %v2262_v2  ;;  %v2467_v54 = vadd.f32 %v5448_v23, %v2263_v8  ;;  %v5946_v8 = vld [vmem:[#allocation10_spill] sm:$0xff] }
 0x200   : > { %v2955_v60 = vadd.f32 %v2954_v55, %v2892_v58  ;;  %v3024_v3 = vadd.f32 %v3023_v21, %v2993_v53  ;;  %v2893_v5 = vadd.f32 %v2780_v15, %v2683_v0  ;;  %v2688_v33 = vadd.f32 %v3856_v52, %v2462_v34  ;;  %v3891_v57 = vpop.f32.mrf.mxu0 }
 0x201   : > { %2927 = vst [vmem:[%s5540_s10 + $0x38] sm:$0xff] %v2895_v1  ;;  %v2583_v49 = vpop.f32.mrf.mxu1  ;;  %v2997_v35 = vmul.f32 %v2895_v1, %v2895_v1  ;;  %v2266_v4 = vadd.f32 %v5462_v6, %v5351_v22  ;;  %v2465_v52 = vadd.f32 %v5452_v14, %v2261_v13  ;;  %v5951_v13 = vld [vmem:[#allocation34_spill] sm:$0xff] }
 0x202   : > { %v3025_v59 = vadd.f32 %v3024_v3, %v2994_v62  ;;  %2925 = vst [vmem:[%s5540_s10 + $0x28] sm:$0xff] %v2893_v5  ;;  %v2956_v48 = vadd.f32 %v2955_v60, %v2893_v5  ;;  %v2995_v26 = vmul.f32 %v2893_v5, %v2893_v5  ;;  %v2898_v17 = vadd.f32 %v3890_v11, %v2688_v33  ;;  %v2796_v39 = vpop.f32.mrf.mxu0  ;;  %v5939_v3 = vld [vmem:[#allocation16_spill] sm:$0xff]  ;;  %v5940_v5 = vld [vmem:[#allocation25_spill] sm:$0xff] }
 0x203   : > { %v2686_v38 = vadd.f32 %v2583_v49, %v2460_v12  ;;  %v3857_v30 = vpop.f32.mrf.mxu1  ;;  %v2470_v60 = vadd.f32 %v5456_v42, %v2266_v4  ;;  %v2267_v33 = vadd.f32 %v5940_v5, %v5939_v3 }
 0x204   : > { %v2957_v29 = vadd.f32 %v2956_v48, %v2894_v45  ;;  %v3026_v43 = vadd.f32 %v3025_v59, %v2995_v26  ;;  %2930 = vst [vmem:[%s5540_s10 + $0x50] sm:$0xff] %v2898_v17  ;;  %v2689_v46 = vadd.f32 %v3857_v30, %v2463_v24  ;;  %v3894_v15 = vpop.f32.mrf.mxu0  ;;  %v2464_v45 = vadd.f32 %v5444_v16, %v2260_v27  ;;  %v5941_v59 = vld [vmem:[#allocation9_spill] sm:$0xff]  ;;  %v5942_v26 = vld [vmem:[#allocation14_spill] sm:$0xff] }
 0x205   : > { %v2896_v20 = vadd.f32 %v2793_v51, %v2686_v38  ;;  %v2586_v18 = vpop.f32.mrf.mxu1  ;;  %v2264_v51 = vadd.f32 %v5466_v40, %v5354_v63  ;;  %v3000_v23 = vmul.f32 %v2898_v17, %v2898_v17 }
 0x206   : > { %v3027_v19 = vadd.f32 %v3026_v43, %v2996_v44  ;;  %v2958_v36 = vadd.f32 %v2957_v29, %v2895_v1  ;;  %v2899_v10 = vadd.f32 %v3891_v57, %v2689_v46  ;;  %v2687_v25 = vadd.f32 %v2586_v18, %v2461_v32  ;;  %v2809_v31 = vpop.f32.mrf.mxu0  ;;  %v5944_v44 = vld [vmem:[#allocation27_spill] sm:$0xff] }
 0x207   : > { %2928 = vst [vmem:[%s5540_s10 + $0x40] sm:$0xff] %v2896_v20  ;;  %v3860_v56 = vpop.f32.mrf.mxu1  ;;  %v2998_v11 = vmul.f32 %v2896_v20, %v2896_v20  ;;  %v2468_v48 = vadd.f32 %v5941_v59, %v2264_v51  ;;  %v2471_v29 = vadd.f32 %v5944_v44, %v2267_v33  ;;  %v5960_v44 = vld [vmem:[#allocation12_spill] sm:$0xff] }
 0x208   : > { %v2959_v58 = vadd.f32 %v2958_v36, %v2896_v20  ;;  %v3028_v34 = vadd.f32 %v3027_v19, %v2997_v35  ;;  %2931 = vst [vmem:[%s5540_s10 + $0x58] sm:$0xff] %v2899_v10  ;;  %v2897_v37 = vadd.f32 %v2796_v39, %v2687_v25  ;;  %v3895_v7 = vpop.f32.mrf.mxu0  ;;  %v2692_v9 = vadd.f32 %v3860_v56, %v2466_v50  ;;  %v5947_v50 = vld [vmem:[#allocation23_spill] sm:$0xff]  ;;  %v5948_v56 = vld [vmem:[#allocation20_spill] sm:$0xff] }
 0x209   : > { %v2599_v47 = vpop.f32.mrf.mxu1  ;;  %v3001_v63 = vmul.f32 %v2899_v10, %v2899_v10 }
 0x20a   : > { %v3029_v53 = vadd.f32 %v3028_v34, %v2998_v11  ;;  %2929 = vst [vmem:[%s5540_s10 + $0x48] sm:$0xff] %v2897_v37  ;;  %v2960_v16 = vadd.f32 %v2959_v58, %v2897_v37  ;;  %v2999_v21 = vmul.f32 %v2897_v37, %v2897_v37  ;;  %v2690_v55 = vadd.f32 %v2599_v47, %v2464_v45  ;;  %v2812_v0 = vpop.f32.mrf.mxu0  ;;  %v5949_v58 = vld [vmem:[#allocation13_spill] sm:$0xff] }
 0x20b   : > { %v2902_v41 = vadd.f32 %v3894_v15, %v2692_v9  ;;  %v3861_v62 = vpop.f32.mrf.mxu1  ;;  %v5945_v15 = vld [vmem:[#allocation18_spill] sm:$0xff]  ;;  %v2268_v11 = vadd.f32 %v5949_v58, %v5948_v56 }
 0x20c   : > { %v2961_v28 = vadd.f32 %v2960_v16, %v2898_v17  ;;  %v3030_v61 = vadd.f32 %v3029_v53, %v2999_v21  ;;  %v2900_v1 = vadd.f32 %v2809_v31, %v2690_v55  ;;  %v2693_v22 = vadd.f32 %v3861_v62, %v2467_v54  ;;  %v3898_v6 = vpop.f32.mrf.mxu0  ;;  %v5943_v17 = vld [vmem:[#allocation30_spill] sm:$0xff]  ;;  %v5952_v21 = vld [vmem:[#allocation28_spill] sm:$0xff] }
 0x20d   : > { %2934 = vst [vmem:[%s5540_s10 + $0x70] sm:$0xff] %v2902_v41  ;;  %v2602_v57 = vpop.f32.mrf.mxu1  ;;  %v2265_v39 = vadd.f32 %v5943_v17, %v5942_v26  ;;  %v2270_v35 = vadd.f32 %v5946_v8, %v5945_v15  ;;  %v5950_v54 = vld [vmem:[#allocation22_spill] sm:$0xff]  ;;  %v3004_v9 = vmul.f32 %v2902_v41, %v2902_v41 }
 0x20e   : > { %v3031_v40 = vadd.f32 %v3030_v61, %v3000_v23  ;;  %2932 = vst [vmem:[%s5540_s10 + $0x60] sm:$0xff] %v2900_v1  ;;  %v2962_v12 = vadd.f32 %v2961_v28, %v2899_v10  ;;  %v2903_v24 = vadd.f32 %v3895_v7, %v2693_v22  ;;  %v2825_v49 = vpop.f32.mrf.mxu0  ;;  %v2691_v14 = vadd.f32 %v2602_v57, %v2465_v52  ;;  %v5953_v22 = vld [vmem:[#allocation15_spill] sm:$0xff]  ;;  %v5954_v52 = vld [vmem:[#allocation26_spill] sm:$0xff] }
 0x20f   : > { %v3864_v42 = vpop.f32.mrf.mxu1  ;;  %v3002_v2 = vmul.f32 %v2900_v1, %v2900_v1  ;;  %v2469_v45 = vadd.f32 %v5947_v50, %v2265_v39  ;;  %v2271_v4 = vadd.f32 %v5951_v13, %v5950_v54  ;;  %v2474_v55 = vadd.f32 %v5952_v21, %v2270_v35  ;;  %v5956_v57 = vld [vmem:[#allocation11_spill] sm:$0xff]  ;;  %v5958_v26 = vld [vmem:[#allocation38_spill] sm:$0xff]  ;;  %v5962_v35 = vld [vmem:[#allocation17_spill] sm:$0xff] }
 0x210   : > { %v2963_v32 = vadd.f32 %v2962_v12, %v2900_v1  ;;  %v3032_v27 = vadd.f32 %v3031_v40, %v3001_v63  ;;  %2935 = vst [vmem:[%s5540_s10 + $0x78] sm:$0xff] %v2903_v24  ;;  %v2696_v38 = vadd.f32 %v3864_v42, %v2470_v60  ;;  %v3899_v30 = vpop.f32.mrf.mxu0  ;;  %v2901_v43 = vadd.f32 %v2812_v0, %v2691_v14  ;;  %v5955_v60 = vld [vmem:[#allocation36_spill] sm:$0xff]  ;;  %v5964_v50 = vld [vmem:[#allocation35_spill] sm:$0xff]  ;;  %v5965_v13 = vld [vmem:[#allocation37_spill] sm:$0xff] }
 0x211   : > { %v2615_v46 = vpop.f32.mrf.mxu1  ;;  %v3005_v62 = vmul.f32 %v2903_v24, %v2903_v24  ;;  %v2269_v3 = vadd.f32 %v5955_v60, %v5954_v52  ;;  %v2475_v63 = vadd.f32 %v5956_v57, %v2271_v4  ;;  %v5971_v57 = vld [vmem:[#allocation41_spill] sm:$0xff] }
 0x212   : > { %v3033_v20 = vadd.f32 %v3032_v27, %v3002_v2  ;;  %v2906_v18 = vadd.f32 %v3898_v6, %v2696_v38  ;;  %v2694_v19 = vadd.f32 %v2615_v46, %v2468_v48  ;;  %v2828_v36 = vpop.f32.mrf.mxu0  ;;  %2933 = vst [vmem:[%s5540_s10 + $0x68] sm:$0xff] %v2901_v43  ;;  %v2964_v10 = vadd.f32 %v2963_v32, %v2901_v43  ;;  %v5957_v48 = vld [vmem:[#allocation31_spill] sm:$0xff]  ;;  %v5959_v38 = vld [vmem:[#allocation33_spill] sm:$0xff] }
 0x213   : > { %v3003_v25 = vmul.f32 %v2901_v43, %v2901_v43  ;;  %v3865_v31 = vpop.f32.mrf.mxu1  ;;  %v2472_v6 = vadd.f32 %v5953_v22, %v2268_v11  ;;  %v5970_v22 = vld [vmem:[#allocation46_spill] sm:$0xff] }
 0x214   : > { %2938 = vst [vmem:[%s5540_s10 + $0x90] sm:$0xff] %v2906_v18  ;;  %v2904_v34 = vadd.f32 %v2825_v49, %v2694_v19  ;;  %v2697_v37 = vadd.f32 %v3865_v31, %v2471_v29  ;;  %v3902_v7 = vpop.f32.mrf.mxu0  ;;  %v2965_v47 = vadd.f32 %v2964_v10, %v2902_v41  ;;  %v5961_v29 = vld [vmem:[#allocation40_spill] sm:$0xff] }
 0x215   : > { %v3034_v53 = vadd.f32 %v3033_v20, %v3003_v25  ;;  %v2618_v16 = vpop.f32.mrf.mxu1  ;;  %v2272_v43 = vadd.f32 %v5961_v29, %v5960_v44  ;;  %v5963_v20 = vld [vmem:[#allocation42_spill] sm:$0xff] }
 0x216   : > { %2936 = vst [vmem:[%s5540_s10 + $0x80] sm:$0xff] %v2904_v34  ;;  %v2907_v0 = vadd.f32 %v3899_v30, %v2697_v37  ;;  %v2695_v51 = vadd.f32 %v2618_v16, %v2469_v45  ;;  %v2841_v23 = vpop.f32.mrf.mxu0  ;;  %v2966_v61 = vadd.f32 %v2965_v47, %v2903_v24  ;;  %v3006_v12 = vmul.f32 %v2904_v34, %v2904_v34  ;;  %v5967_v47 = vld [vmem:[#allocation44_spill] sm:$0xff] }
 0x217   : > { %v3035_v28 = vadd.f32 %v3034_v53, %v3004_v9  ;;  %v3868_v1 = vpop.f32.mrf.mxu1  ;;  %v2274_v24 = vadd.f32 %v5958_v26, %v5957_v48  ;;  %v2473_v30 = vadd.f32 %v5959_v38, %v2269_v3  ;;  %v2275_v19 = vadd.f32 %v5963_v20, %v5962_v35  ;;  %v5966_v9 = vld [vmem:[#allocation19_spill] sm:$0xff]  ;;  %v5976_v38 = vld [vmem:[#allocation50_spill] sm:$0xff]  ;;  %v5977_v20 = vld [vmem:[#allocation45_spill] sm:$0xff] }
 0x218   : > { %2939 = vst [vmem:[%s5540_s10 + $0x98] sm:$0xff] %v2907_v0  ;;  %v2905_v41 = vadd.f32 %v2828_v36, %v2695_v51  ;;  %v2700_v5 = vadd.f32 %v3868_v1, %v2474_v55  ;;  %v3903_v33 = vpop.f32.mrf.mxu0  ;;  %v2967_v40 = vadd.f32 %v2966_v61, %v2904_v34  ;;  %v3008_v36 = vmul.f32 %v2906_v18, %v2906_v18  ;;  %v5968_v55 = vld [vmem:[#allocation39_spill] sm:$0xff]  ;;  %v5969_v1 = vld [vmem:[#allocation21_spill] sm:$0xff] }
 0x219   : > { %v3036_v49 = vadd.f32 %v3035_v28, %v3005_v62  ;;  %v2631_v59 = vpop.f32.mrf.mxu1  ;;  %v2478_v45 = vadd.f32 %v5964_v50, %v2274_v24  ;;  %v3009_v34 = vmul.f32 %v2907_v0, %v2907_v0  ;;  %v2476_v4 = vadd.f32 %v5965_v13, %v2272_v43 }
 0x21a   : > { %2937 = vst [vmem:[%s5540_s10 + $0x88] sm:$0xff] %v2905_v41  ;;  %v3007_v17 = vmul.f32 %v2905_v41, %v2905_v41  ;;  %v2910_v39 = vadd.f32 %v3902_v7, %v2700_v5  ;;  %v2698_v14 = vadd.f32 %v2631_v59, %v2472_v6  ;;  %v2844_v42 = vpop.f32.mrf.mxu0  ;;  %v2968_v2 = vadd.f32 %v2967_v40, %v2905_v41  ;;  %v5972_v40 = vld [vmem:[#allocation24_spill] sm:$0xff] }
 0x21b   : > { %v3037_v32 = vadd.f32 %v3036_v49, %v3006_v12  ;;  %v3869_v27 = vpop.f32.mrf.mxu1  ;;  %v2273_v53 = vadd.f32 %v5967_v47, %v5966_v9  ;;  %v2479_v51 = vadd.f32 %v5968_v55, %v2275_v19  ;;  %v5973_v12 = vld [vmem:[#allocation48_spill] sm:$0xff] }
 0x21c   : > { %2942 = vst [vmem:[%s5540_s10 + $0xb0] sm:$0xff] %v2910_v39  ;;  %v2908_v46 = vadd.f32 %v2841_v23, %v2698_v14  ;;  %v2701_v15 = vadd.f32 %v3869_v27, %v2475_v63  ;;  %v3906_v8 = vpop.f32.mrf.mxu0  ;;  %v2969_v10 = vadd.f32 %v2968_v2, %v2906_v18  ;;  %v2276_v49 = vadd.f32 %v5973_v12, %v5972_v40  ;;  %v5975_v27 = vld [vmem:[#allocation29_spill] sm:$0xff] }
 0x21d   : > { %v3038_v25 = vadd.f32 %v3037_v32, %v3007_v17  ;;  %v2634_v31 = vpop.f32.mrf.mxu1  ;;  %v2477_v63 = vadd.f32 %v5971_v57, %v2273_v53  ;;  %v3012_v24 = vmul.f32 %v2910_v39, %v2910_v39  ;;  %v5974_v32 = vld [vmem:[#allocation43_spill] sm:$0xff]  ;;  %v5981_v53 = vld [vmem:[#allocation49_spill] sm:$0xff] }
 0x21e   : > { %2940 = vst [vmem:[%s5540_s10 + $0xa0] sm:$0xff] %v2908_v46  ;;  %v2911_v56 = vadd.f32 %v3903_v33, %v2701_v15  ;;  %v2699_v58 = vadd.f32 %v2634_v31, %v2473_v30  ;;  %v2857_v11 = vpop.f32.mrf.mxu0  ;;  %v2970_v7 = vadd.f32 %v2969_v10, %v2907_v0  ;;  %v3010_v62 = vmul.f32 %v2908_v46, %v2908_v46 }
 0x21f   : > { %v3039_v37 = vadd.f32 %v3038_v25, %v3008_v36  ;;  %v3872_v54 = vpop.f32.mrf.mxu1  ;;  %v2278_v0 = vadd.f32 %v5970_v22, %v5969_v1  ;;  %v2279_v30 = vadd.f32 %v5976_v38, %v5975_v27  ;;  %v2480_v19 = vadd.f32 %v5977_v20, %v2276_v49  ;;  %v5978_v36 = vld [vmem:[#allocation32_spill] sm:$0xff] }
 0x220   : > { %2943 = vst [vmem:[%s5540_s10 + $0xb8] sm:$0xff] %v2911_v56  ;;  %v2909_v18 = vadd.f32 %v2844_v42, %v2699_v58  ;;  %v2704_v16 = vadd.f32 %v3872_v54, %v2478_v45  ;;  %v3907_v21 = vpop.f32.mrf.mxu0  ;;  %v2971_v23 = vadd.f32 %v2970_v7, %v2908_v46  ;;  %v3013_v43 = vmul.f32 %v2911_v56, %v2911_v56 }
 0x221   : > { %v3040_v28 = vadd.f32 %v3039_v37, %v3009_v34  ;;  %v2647_v61 = vpop.f32.mrf.mxu1  ;;  %v2482_v2 = vadd.f32 %v5974_v32, %v2278_v0  ;;  %v5980_v34 = vld [vmem:[#allocation47_spill] sm:$0xff] }
 0x222   : > { %2941 = vst [vmem:[%s5540_s10 + $0xa8] sm:$0xff] %v2909_v18  ;;  %v3011_v6 = vmul.f32 %v2909_v18, %v2909_v18  ;;  %v2914_v52 = vadd.f32 %v3906_v8, %v2704_v16  ;;  %v2702_v60 = vadd.f32 %v2647_v61, %v2476_v4  ;;  %v2860_v3 = vpop.f32.mrf.mxu0  ;;  %v2972_v5 = vadd.f32 %v2971_v23, %v2909_v18 }
 0x223   : > { %v3041_v41 = vadd.f32 %v3040_v28, %v3010_v62  ;;  %v3873_v33 = vpop.f32.mrf.mxu1  ;;  %v2483_v37 = vadd.f32 %v5980_v34, %v2279_v30 }
 0x224   : > { %2946 = vst [vmem:[%s5540_s10 + $0xd0] sm:$0xff] %v2914_v52  ;;  %v2912_v59 = vadd.f32 %v2857_v11, %v2702_v60  ;;  %v2705_v48 = vadd.f32 %v3873_v33, %v2479_v51  ;;  %v3910_v26 = vpop.f32.mrf.mxu0  ;;  %v2973_v17 = vadd.f32 %v2972_v5, %v2910_v39  ;;  %v5979_v39 = vld [vmem:[#allocation51_spill] sm:$0xff]  ;;  %v3016_v55 = vmul.f32 %v2914_v52, %v2914_v52 }
 0x225   : > { %v3042_v14 = vadd.f32 %v3041_v41, %v3011_v6  ;;  %v2650_v42 = vpop.f32.mrf.mxu1  ;;  %v2277_v10 = vadd.f32 %v5979_v39, %v5978_v36 }
 0x226   : > { %2944 = vst [vmem:[%s5540_s10 + $0xc0] sm:$0xff] %v2912_v59  ;;  %v2915_v44 = vadd.f32 %v3907_v21, %v2705_v48  ;;  %v2703_v29 = vadd.f32 %v2650_v42, %v2477_v63  ;;  %v2974_v15 = vadd.f32 %v2973_v17, %v2911_v56  ;;  %v2873_v35 = vpop.f32.mrf.mxu0  ;;  %v3014_v45 = vmul.f32 %v2912_v59, %v2912_v59 }
 0x227   : > { %v3043_v46 = vadd.f32 %v3042_v14, %v3012_v24  ;;  %v3876_v8 = vpop.f32.mrf.mxu1  ;;  %v2481_v18 = vadd.f32 %v5981_v53, %v2277_v10 }
 0x228   : > { %2947 = vst [vmem:[%s5540_s10 + $0xd8] sm:$0xff] %v2915_v44  ;;  %v2913_v25 = vadd.f32 %v2860_v3, %v2703_v29  ;;  %v2708_v31 = vadd.f32 %v3876_v8, %v2482_v2  ;;  %v2975_v50 = vadd.f32 %v2974_v15, %v2912_v59  ;;  %v3911_v47 = vpop.f32.mrf.mxu0  ;;  %v3017_v1 = vmul.f32 %v2915_v44, %v2915_v44 }
 0x229   : > { %v3044_v58 = vadd.f32 %v3043_v46, %v3013_v43  ;;  %v2663_v11 = vpop.f32.mrf.mxu1 }
 0x22a   : > { %2945 = vst [vmem:[%s5540_s10 + $0xc8] sm:$0xff] %v2913_v25  ;;  %v3015_v56 = vmul.f32 %v2913_v25, %v2913_v25  ;;  %v2918_v7 = vadd.f32 %v3910_v26, %v2708_v31  ;;  %v2706_v54 = vadd.f32 %v2663_v11, %v2480_v19  ;;  %v2976_v4 = vadd.f32 %v2975_v50, %v2913_v25  ;;  %v2876_v6 = vpop.f32.mrf.mxu0 }
 0x22b   : > { %v3045_v13 = vadd.f32 %v3044_v58, %v3014_v45  ;;  %v3877_v9 = vpop.f32.mrf.mxu1 }
 0x22c   : > { %2950 = vst [vmem:[%s5540_s10 + $0xf0] sm:$0xff] %v2918_v7  ;;  %v2916_v16 = vadd.f32 %v2873_v35, %v2706_v54  ;;  %v2709_v21 = vadd.f32 %v3877_v9, %v2483_v37  ;;  %v2977_v51 = vadd.f32 %v2976_v4, %v2914_v52 }
 0x22d   : > { %v3046_v23 = vadd.f32 %v3045_v13, %v3015_v56  ;;  %v2666_v62 = vpop.f32.mrf.mxu1 }
 0x22e   : > { %2948 = vst [vmem:[%s5540_s10 + $0xe0] sm:$0xff] %v2916_v16  ;;  %v2919_v28 = vadd.f32 %v3911_v47, %v2709_v21  ;;  %v2707_v61 = vadd.f32 %v2666_v62, %v2481_v18  ;;  %v2978_v0 = vadd.f32 %v2977_v51, %v2915_v44  ;;  %v3018_v3 = vmul.f32 %v2916_v16, %v2916_v16 }
 0x22f   : > { %v3047_v22 = vadd.f32 %v3046_v23, %v3016_v55 }
 0x230   : > { %2951 = vst [vmem:[%s5540_s10 + $0xf8] sm:$0xff] %v2919_v28  ;;  %v2917_v52 = vadd.f32 %v2876_v6, %v2707_v61  ;;  %v2979_v60 = vadd.f32 %v2978_v0, %v2916_v16 }
 0x231   : > { %v3048_v41 = vadd.f32 %v3047_v22, %v3017_v1 }
 0x232   : > { %2949 = vst [vmem:[%s5540_s10 + $0xe8] sm:$0xff] %v2917_v52  ;;  %v3019_v5 = vmul.f32 %v2917_v52, %v2917_v52  ;;  %v2980_v57 = vadd.f32 %v2979_v60, %v2917_v52 }
 0x233   : > { %v3049_v33 = vadd.f32 %v3048_v41, %v3018_v3 }
 0x234   : > { %4007 = shalt.err (!%p4004_p3)
}
 0x235   : > { %s4008_s5 = scalar_lea.hbm %s5657_s22, 4096  ;;  %s4012_s9 = scalar_lea.hbm %s5773_s2, 8192 }
 0x236   : > { %p4009_p4 = scmp.ne.s32.totalorder %s5657_s22, %s4008_s5  ;;  %p4013_p9 = scmp.lt.s32.totalorder %s5657_s22, %s5773_s2 }
 0x237   : > { %p4014_p10 = scmp.lt.s32.totalorder %s4012_s9, %s4008_s5 }
 0x238   : > { %p4010_p7 = pnand %p4009_p4, %p4182_p5 }
 0x239   : > { %p4015_p11 = por %p4014_p10, %p4013_p9 }
 0x23a   : > { %p4011_p8 = pneg %p4010_p7 }
 0x23c   : > { %p4016_p12 = pnand %p4015_p11, %p4011_p8 }
 0x23e   : > { %4019 = shalt.err (!%p4016_p12)
}
 0x23f   : > { %s4113_s13 = smov 128   ;;  %s4114_s14 = smov 8   ;;  %v3020_v63 = vmul.f32 %v2918_v7, %v2918_v7  ;;  %v2981_v40 = vadd.f32 %v2980_v57, %v2918_v7  ;;  %v3050_v12 = vadd.f32 %v3049_v33, %v3019_v5  ;;  %v3021_v49 = vmul.f32 %v2919_v28, %v2919_v28 }
 0x240   : > { %3925 = dma.vmem_to_hbm [thread:$0]  (%p4182_p5), %s5659_s12, 4096, %s5657_s22, %s3061_s23, %s4113_s13, %s4113_s13, %s4114_s14  }
 0x241   : > { %v2982_v59 = vadd.f32 %v2981_v40, %v2919_v28  ;;  %v3051_v48 = vadd.f32 %v3050_v12, %v3020_v63  ;;  %s3065_s27 = sand.u32 1, %s4163_s19   ;;  %s3448_s12 = sshll.u32 %s4163_s19, 4 }
 0x242   : > { %s200_s22 = scalar_lea.vmem [#allocation4], %s5522_s8  ;;  %s206_s28 = scalar_lea.vmem [#allocation6], %s5522_s8 }
 0x243   : > { %v2983_v26 = vrot.slane %v2982_v59, 4  ;;  %v3052_v24 = vadd.f32 %v3051_v48, %v3021_v49  ;;  %s3098_s23 = sshll.u32 %s200_s22, 4  ;;  %s3111_s29 = sshll.u32 %s206_s28, 4  ;;  %s5697_s23 = int_to_ptr.vmem [resolvable:$true] %s3098_s23  ;;  %s5704_s29 = int_to_ptr.vmem [resolvable:$true] %s3111_s29 }
 0x244   : > { %s5695_s6 = scalar_lea.hbm %s5774_s3, %s3448_s12  ;;  %s5702_s9 = scalar_lea.hbm %s5775_s4, %s3448_s12 }
 0x245   : > { %v3053_v17 = vrot.slane %v3052_v24, 4  ;;  %v2984_v14 = vadd.f32 %v2983_v26, %v2982_v59  ;;  %s5706_s10 = scalar_lea.sflag [#allocation5], %s3065_s27  ;;  %s4020_s11 = scalar_lea.vmem %s5697_s23, 16 }
 0x246   : > { %p4021_p13 = scmp.ne.s32.totalorder %s5697_s23, %s4020_s11  ;;  %s4115_s13 = smov [#allocation4]  }
 0x247   : > { %v2985_v42 = vrot.slane %v2984_v14, 2  ;;  %v3054_v32 = vadd.f32 %v3053_v17, %v3052_v24  ;;  %s4024_s14 = sshll.u32 %s4115_s13, 4  ;;  %s4025_s14 = int_to_ptr.vmem [resolvable:$false] %s4024_s14 }
 0x248   : > { %p4022_p0 = pnand %p4021_p13, %p4182_p5  ;;  %s4026_s30 = scalar_lea.vmem %s4025_s14, 32 }
 0x249   : > { %v2986_v2 = vadd.f32 %v2985_v42, %v2984_v14  ;;  %v3055_v27 = vrot.slane %v3054_v32, 2  ;;  %p4027_p2 = scmp.lt.s32.totalorder %s5697_s23, %s4025_s14  ;;  %p4028_p3 = scmp.lt.s32.totalorder %s4026_s30, %s4020_s11 }
 0x24a   : > { %p4023_p1 = pneg %p4022_p0 }
 0x24b   : > { %v2987_v38 = vrot.slane %v2986_v2, 1  ;;  %v3056_v30 = vadd.f32 %v3055_v27, %v3054_v32  ;;  %p4029_p4 = por %p4028_p3, %p4027_p2 }
 0x24d   : > { %v2988_v44 = vadd.f32 %v2987_v38, %v2986_v2  ;;  %v3057_v29 = vrot.slane %v3056_v30, 1  ;;  %p4030_p7 = pnand %p4029_p4, %p4023_p1 }
 0x24f   : > { %2989 = vst [vmem:[%s200_s22] sm:$0x1] %v2988_v44  ;;  %v3058_v43 = vadd.f32 %v3057_v29, %v3056_v30 }
 0x250   : > { %4033 = shalt.err (!%p4030_p7)
}
 0x251   : > { %s4034_s27 = scalar_lea.hbm %s5695_s6, 16  ;;  %s4038_s5 = scalar_lea.hbm %s5774_s3, 32 }
 0x252   : > { %p4035_p8 = scmp.ne.s32.totalorder %s5695_s6, %s4034_s27  ;;  %p4039_p11 = scmp.lt.s32.totalorder %s5695_s6, %s5774_s3 }
 0x253   : > { %p4040_p12 = scmp.lt.s32.totalorder %s4038_s5, %s4034_s27 }
 0x254   : > { %p4036_p9 = pnand %p4035_p8, %p4182_p5 }
 0x255   : > { %p4041_p13 = por %p4040_p12, %p4039_p11 }
 0x256   : > { %p4037_p10 = pneg %p4036_p9 }
 0x258   : > { %p4042_p0 = pnand %p4041_p13, %p4037_p10 }
 0x25a   : > { %4045 = shalt.err (!%p4042_p0)
}
 0x25b   : > { %3926 = dma.vmem_to_hbm [thread:$0]  (%p4182_p5), %s5697_s23, 16, %s5695_s6, %s5706_s10   ;;  %3059 = vst [vmem:[%s206_s28] sm:$0x1] %v3058_v43 }
 0x25c   : > { %s4046_s11 = scalar_lea.vmem %s5704_s29, 16  ;;  %s4116_s13 = smov [#allocation6]  }
 0x25d   : > { %p4047_p1 = scmp.ne.s32.totalorder %s5704_s29, %s4046_s11  ;;  %s4050_s14 = sshll.u32 %s4116_s13, 4  ;;  %s4051_s14 = int_to_ptr.vmem [resolvable:$false] %s4050_s14 }
 0x25e   : > { %s4052_s30 = scalar_lea.vmem %s4051_s14, 32  ;;  %p4053_p4 = scmp.lt.s32.totalorder %s5704_s29, %s4051_s14 }
 0x25f   : > { %p4048_p2 = pnand %p4047_p1, %p4182_p5  ;;  %p4054_p7 = scmp.lt.s32.totalorder %s4052_s30, %s4046_s11 }
 0x261   : > { %p4049_p3 = pneg %p4048_p2  ;;  %p4055_p8 = por %p4054_p7, %p4053_p4 }
 0x263   : > { %p4056_p9 = pnand %p4055_p8, %p4049_p3 }
 0x265   : > { %4059 = shalt.err (!%p4056_p9)
}
 0x266   : > { %s4060_s8 = scalar_lea.hbm %s5702_s9, 16  ;;  %s4064_s6 = scalar_lea.hbm %s5775_s4, 32 }
 0x267   : > { %p4061_p10 = scmp.ne.s32.totalorder %s5702_s9, %s4060_s8  ;;  %p4065_p13 = scmp.lt.s32.totalorder %s5702_s9, %s5775_s4 }
 0x268   : > { %p4066_p0 = scmp.lt.s32.totalorder %s4064_s6, %s4060_s8 }
 0x269   : > { %p4062_p11 = pnand %p4061_p10, %p4182_p5 }
 0x26a   : > { %p4067_p1 = por %p4066_p0, %p4065_p13 }
 0x26b   : > { %p4063_p12 = pneg %p4062_p11 }
 0x26d   : > { %p4068_p2 = pnand %p4067_p1, %p4063_p12 }
 0x26f   : > { %4071 = shalt.err (!%p4068_p2)
}
 0x270   : > { %3927 = dma.vmem_to_hbm [thread:$0]  (%p4182_p5), %s5704_s29, 16, %s5702_s9, %s5706_s10  }
 0x271 PF: > { %p3941_p3 = scmp.ge.s32.totalorder %s4110_s18, 2  ;;  %s3123_s22 = sand.u32 1, %s4098_s15  }
 0x272   : > { %s3124_s5 = scalar_lea.sflag [#allocation3], %s3123_s22 }
 0x273   : > { %p3932_p4 = pnand %p3941_p3, %p4186_p6 }
 0x275   : > { %p3933_p7 = pneg %p3932_p4 }
 0x277   : > { %4089 = dma.done.wait (%p3933_p7), %s3124_s5, 4096  }
 0x278   : > { %4091 = vsyncadd (%p3933_p7), %s3124_s5, 4294963200  ;;  %s3132_s19 = sand.u32 1, %s3223_s20  }
 0x279   : > { %s3133_s25 = scalar_lea.sflag [#allocation5], %s3132_s19 }
 0x27a   : > { %4093 = dma.done.wait (%p3933_p7), %s3133_s25, 32  }
 0x27b   : > { %4095 = vsyncadd (%p3933_p7), %s3133_s25, 4294967264  ;;  %p18_p5 = scmp.ge.s32.totalorder %s4167_s21, 4   ;;  %s5982_s15 = smov %s4102_s16 }
 0x27c   : > { %s5983_s16 = smov %s4106_s17  ;;  %s5984_s17 = smov %s4180_s24 }
 0x27d   : > { %s5985_s18 = smov %s4167_s21  ;;  %20 = sbr.rel (!%p18_p5) target bundleno = 5 (0x5), region = 95 }
 0x282   :  { %3145 = vsyncpa [#allocation3], 1 }
 0x283   :  { %3147 = vsyncpa [#allocation3 + $0x1], 1 }
 0x284   :  { %3148 = vsyncpa [#allocation5], 1 }
 0x285   :  { %3150 = vsyncpa [#allocation5 + $0x1], 1 }

</bundles_post_ra>
